<compile_context>
chip_gen: v5e
topology: v5e:2x2
jax: 0.10.0
libtpu: 0.0.40
codegen_flags: <defaults>
</compile_context>

<pallas_src>
import numpy as np
import jax
import jax.numpy as jnp
from jax.experimental import pallas as pl
from jax.experimental.pallas import tpu as pltpu

# ------------------------- small synthetic config -------------------------
B, C, T, H, W = 2, 3, 4, 16, 16          # video: (B, 3, T, H, W)
PATCH, TUBELET = 8, 2
HIDDEN, HEADS, LAYERS, MLP = 32, 4, 2, 128
NUM_OUTPUTS = 8
HEAD_DIM = HIDDEN // HEADS
S = (T // TUBELET) * (H // PATCH) * (W // PATCH)   # tokens per clip = 8
KDIM = C * TUBELET * PATCH * PATCH                 # im2col features = 384
OUT_PAD = 128                                      # lane-dense padded head width
LN_EPS = 1e-12                                     # HF VideoMAE layer_norm_eps

# Row layout of the per-layer packed vector slab (width 128, f32).
ROW_LN1_G, ROW_LN1_B, ROW_BQKV, ROW_BO, ROW_LN2_G, ROW_LN2_B, ROW_B1, ROW_B2 = range(8)


# ------------------------------ fused kernel -------------------------------
def _layernorm(x, g, b):
    mean = jnp.mean(x, axis=-1, keepdims=True)
    xc = x - mean
    var = jnp.mean(xc * xc, axis=-1, keepdims=True)
    return xc * jax.lax.rsqrt(var + LN_EPS) * g + b


def _split_heads(m):
    # (S, HIDDEN) -> (HEADS, S, HEAD_DIM)
    return jnp.transpose(m.reshape(S, HEADS, HEAD_DIM), (1, 0, 2))


def fused_forward_kernel(patches_ref, posb_ref, pemb_w_ref,
                         wqkv_ref, wo_ref, w1_ref, w2_ref, vecs_ref,
                         reg_w_ref, reg_b_ref, out_ref):
    f32, bf16 = jnp.float32, jnp.bfloat16
    scale = 1.0 / float(np.sqrt(HEAD_DIM))

    # Tubelet patch embedding (Conv3d as im2col matmul). Conv bias + fixed sincos positional
    # embedding are both folded into posb (broadcast add, no concatenate).
    x = jnp.dot(patches_ref[...].astype(bf16), pemb_w_ref[...],
                preferred_element_type=f32) + posb_ref[...]            # (S, HIDDEN) f32

    for li in range(LAYERS):
        vec = vecs_ref[li]                                             # (8, 128) f32
        ln1_g = vec[ROW_LN1_G:ROW_LN1_G + 1, :HIDDEN]
        ln1_b = vec[ROW_LN1_B:ROW_LN1_B + 1, :HIDDEN]
        bqkv = vec[ROW_BQKV:ROW_BQKV + 1, :3 * HIDDEN]
        bo = vec[ROW_BO:ROW_BO + 1, :HIDDEN]
        ln2_g = vec[ROW_LN2_G:ROW_LN2_G + 1, :HIDDEN]
        ln2_b = vec[ROW_LN2_B:ROW_LN2_B + 1, :HIDDEN]
        b1 = vec[ROW_B1:ROW_B1 + 1, :MLP]
        b2 = vec[ROW_B2:ROW_B2 + 1, :HIDDEN]

        # ---------------- pre-LN multi-head self-attention (fused QKV) --------------
        xn = _layernorm(x, ln1_g, ln1_b)
        qkv = jnp.dot(xn.astype(bf16), wqkv_ref[li],
                      preferred_element_type=f32) + bqkv               # (S, 3*HIDDEN) f32

        q = _split_heads(qkv[:, :HIDDEN]) * scale                      # (HEADS, S, HEAD_DIM)
        k = _split_heads(qkv[:, HIDDEN:2 * HIDDEN])
        v = _split_heads(qkv[:, 2 * HIDDEN:])

        # Score / value einsums stay f32 (tiny contraction dims; softmax numerics in f32).
        s = jnp.einsum('hqd,hkd->hqk', q, k, preferred_element_type=f32)
        s = s - jnp.max(s, axis=-1, keepdims=True)
        p = jnp.exp(s)
        p = p * pl.reciprocal(jnp.sum(p, axis=-1, keepdims=True), approx=True)
        o = jnp.einsum('hqk,hkd->hqd', p, v, preferred_element_type=f32)
        attn = jnp.transpose(o, (1, 0, 2)).reshape(S, HIDDEN)          # merge heads

        # output projection + residual (all in-register)
        x = x + jnp.dot(attn.astype(bf16), wo_ref[li],
                        preferred_element_type=f32) + bo

        # ----------------------------- pre-LN MLP -----------------------------------
        xn = _layernorm(x, ln2_g, ln2_b)
        h1 = jnp.dot(xn.astype(bf16), w1_ref[li], preferred_element_type=f32) + b1
        # TODO(synk): HF VideoMAE uses exact erf-GELU; tanh-approx GELU is used here.
        h1 = jax.nn.gelu(h1, approximate=True)
        x = x + jnp.dot(h1.astype(bf16), w2_ref[li], preferred_element_type=f32) + b2

    # VideoMAEModel with use_mean_pooling=True (kinetics checkpoint): no final LayerNorm.
    # ------------- regressor head: Linear -> ReLU -> Linear (lane-dense store) -------
    rw1 = reg_w_ref[:HIDDEN, :]                                        # (HIDDEN, 128) bf16
    rw2 = reg_w_ref[HIDDEN:, :]                                        # (MLP, 128) bf16 (padded cols)
    rb1 = reg_b_ref[0:1, :]                                            # (1, 128) f32
    rb2 = reg_b_ref[1:2, :]
    y = jnp.maximum(jnp.dot(x.astype(bf16), rw1, preferred_element_type=f32) + rb1, 0.0)
    out_ref[...] = jnp.dot(y.astype(bf16), rw2, preferred_element_type=f32) + rb2


# --------------------------- parameters (synthetic) -------------------------
def sinusoid_table(n_position, d_hid):
    """VideoMAE's fixed get_sinusoid_encoding_table."""
    pos = np.arange(n_position)[:, None]
    i = np.arange(d_hid)[None, :]
    angle = pos / np.power(10000.0, 2 * (i // 2) / d_hid)
    table = np.zeros((n_position, d_hid), dtype=np.float32)
    table[:, 0::2] = np.sin(angle[:, 0::2])
    table[:, 1::2] = np.cos(angle[:, 1::2])
    return jnp.asarray(table)


def _pad_lane(v, width=128):
    v = jnp.asarray(v, jnp.float32).reshape(-1)
    return jnp.zeros((width,), jnp.float32).at[:v.shape[0]].set(v)


def init_params(key):
    def nrm(k, shape, scale=0.02):
        return scale * jax.random.normal(k, shape, dtype=jnp.float32)

    keys = jax.random.split(key, 3 + LAYERS)

    patch_w = nrm(keys[0], (KDIM, HIDDEN))
    patch_b = jnp.zeros((HIDDEN,), jnp.float32)                 # Conv3d bias
    posb = sinusoid_table(S, HIDDEN) + patch_b[None, :]         # bias folded into pos table

    # Regressor head; W2/b2 padded to 128 output columns for a lane-dense final store.
    reg_w1 = nrm(keys[1], (HIDDEN, 128))
    reg_b1 = jnp.zeros((128,), jnp.float32)
    reg_w2 = nrm(keys[2], (128, NUM_OUTPUTS))
    reg_b2 = jnp.zeros((NUM_OUTPUTS,), jnp.float32)
    reg_w2p = jnp.zeros((128, OUT_PAD), jnp.float32).at[:, :NUM_OUTPUTS].set(reg_w2)
    reg_w = jnp.concatenate([reg_w1, reg_w2p], axis=0).astype(jnp.bfloat16)   # (160, 128)
    reg_b = jnp.stack([_pad_lane(reg_b1), _pad_lane(reg_b2)], axis=0)         # (2, 128) f32

    wqkv_l, wo_l, w1_l, w2_l, vec_l = [], [], [], [], []
    for li in range(LAYERS):
        lk = jax.random.split(keys[3 + li], 6)
        wq, wk, wv = (nrm(lk[0], (HIDDEN, HIDDEN)), nrm(lk[1], (HIDDEN, HIDDEN)),
                      nrm(lk[2], (HIDDEN, HIDDEN)))
        wqkv_l.append(jnp.concatenate([wq, wk, wv], axis=1))        # fused QKV (HIDDEN, 3H)
        wo_l.append(nrm(lk[3], (HIDDEN, HIDDEN)))
        w1_l.append(nrm(lk[4], (HIDDEN, MLP)))
        w2_l.append(nrm(lk[5], (MLP, HIDDEN)))

        # VideoMAE attention: learnable q_bias and v_bias, NO key bias.  All zero in this
        # synthetic init, but the slab layout keeps the [q | 0 | v] structure so real
        # checkpoint biases would slot straight in.
        q_bias = jnp.zeros((HIDDEN,), jnp.float32)
        v_bias = jnp.zeros((HIDDEN,), jnp.float32)
        bqkv = jnp.concatenate([q_bias, jnp.zeros((HIDDEN,), jnp.float32), v_bias])

        rows = [jnp.ones((HIDDEN,), jnp.float32),    # ROW_LN1_G
                jnp.zeros((HIDDEN,), jnp.float32),   # ROW_LN1_B
                bqkv,                                # ROW_BQKV
                jnp.zeros((HIDDEN,), jnp.float32),   # ROW_BO
                jnp.ones((HIDDEN,), jnp.float32),    # ROW_LN2_G
                jnp.zeros((HIDDEN,), jnp.float32),   # ROW_LN2_B
                jnp.zeros((MLP,), jnp.float32),      # ROW_B1
                jnp.zeros((HIDDEN,), jnp.float32)]   # ROW_B2
        vec_l.append(jnp.stack([_pad_lane(r) for r in rows], axis=0))  # (8, 128)

    stack = lambda xs: jnp.stack(xs, axis=0)
    return {
        "posb": posb,                                         # (S, HIDDEN) f32
        "pemb_w": patch_w.astype(jnp.bfloat16),               # (KDIM, HIDDEN) bf16
        "wqkv": stack(wqkv_l).astype(jnp.bfloat16),           # (L, HIDDEN, 3*HIDDEN) bf16
        "wo": stack(wo_l).astype(jnp.bfloat16),               # (L, HIDDEN, HIDDEN) bf16
        "w1": stack(w1_l).astype(jnp.bfloat16),               # (L, HIDDEN, MLP) bf16
        "w2": stack(w2_l).astype(jnp.bfloat16),               # (L, MLP, HIDDEN) bf16
        "vecs": stack(vec_l),                                 # (L, 8, 128) f32
        "reg_w": reg_w,                                       # (HIDDEN+MLP, 128) bf16
        "reg_b": reg_b,                                       # (2, 128) f32
    }


# --------------------------------- forward ---------------------------------
def videomae_regressor(video, params):
    b, c, t, h, w = video.shape
    nt, nh, nw = t // TUBELET, h // PATCH, w // PATCH
    assert c == C and nt * nh * nw == S

    # Tubelet patch-embedding == Conv3d(k=(tub,p,p), stride=(tub,p,p)) == im2col + matmul.
    # (im2col reshape/transpose is host-side glue; the matmul runs inside the fused kernel.)
    patches = video.reshape(b, c, nt, TUBELET, nh, PATCH, nw, PATCH)
    patches = patches.transpose(0, 2, 4, 6, 1, 3, 5, 7)       # (b, t', h', w', c, tub, p, p)
    patches = patches.reshape(b * S, KDIM)                    # (B*S, KDIM) f32

    full = lambda arr: pl.BlockSpec(arr.shape, lambda i, _n=arr.ndim: (0,) * _n)

    # One fused pallas_call; grid over batch so v7x's two TensorCores each take one clip.
    out = pl.pallas_call(
        fused_forward_kernel,
        out_shape=jax.ShapeDtypeStruct((b * S, OUT_PAD), jnp.float32),
        grid=(b,),
        in_specs=[
            pl.BlockSpec((S, KDIM), lambda i: (i, 0)),        # patches: one clip per step
            full(params["posb"]),
            full(params["pemb_w"]),
            full(params["wqkv"]),
            full(params["wo"]),
            full(params["w1"]),
            full(params["w2"]),
            full(params["vecs"]),
            full(params["reg_w"]),
            full(params["reg_b"]),
        ],
        out_specs=pl.BlockSpec((S, OUT_PAD), lambda i: (i, 0)),
        compiler_params=pltpu.CompilerParams(dimension_semantics=("parallel",)),
    )(patches, params["posb"], params["pemb_w"], params["wqkv"], params["wo"],
      params["w1"], params["w2"], params["vecs"], params["reg_w"], params["reg_b"])

    # Drop the lane-padding columns outside the kernel.
    return out[:, :NUM_OUTPUTS].reshape(b, S, NUM_OUTPUTS)    # (B, T', num_outputs)


# ----------------------------------- main -----------------------------------
if __name__ == "__main__":
    key = jax.random.PRNGKey(0)
    k_video, k_params = jax.random.split(key)
    video = jax.random.normal(k_video, (B, C, T, H, W), dtype=jnp.float32)
    params = init_params(k_params)

    out = jax.jit(videomae_regressor)(video, params)
    out = jax.block_until_ready(out)

    assert out.shape == (B, S, NUM_OUTPUTS), out.shape
    assert bool(jnp.all(jnp.isfinite(out)))
    print("KERNEL_OK")
</pallas_src>

<mosaic_0001>
module attributes {stable_mosaic.version = 11 : i64} {
  func.func @fused_forward_kernel(%arg0: i32, %arg1: memref<8x384xf32, #tpu.memory_space<vmem>>, %arg2: memref<8x32xf32, #tpu.memory_space<vmem>>, %arg3: memref<384x32xbf16, #tpu.memory_space<vmem>>, %arg4: memref<2x32x96xbf16, #tpu.memory_space<vmem>>, %arg5: memref<2x32x32xbf16, #tpu.memory_space<vmem>>, %arg6: memref<2x32x128xbf16, #tpu.memory_space<vmem>>, %arg7: memref<2x128x32xbf16, #tpu.memory_space<vmem>>, %arg8: memref<2x8x128xf32, #tpu.memory_space<vmem>>, %arg9: memref<160x128xbf16, #tpu.memory_space<vmem>>, %arg10: memref<2x128xf32, #tpu.memory_space<vmem>>, %arg11: memref<8x128xf32, #tpu.memory_space<vmem>>) attributes {dimension_semantics = [#tpu.dimension_semantics<parallel>], iteration_bounds = array<i64: 2>, scalar_prefetch = 0 : i64, scratch_operands = 0 : i64, tpu.core_type = #tpu.core_type<tc>, window_params = [{transform_indices = @transform_0, window_bounds = array<i64: 8, 384>}, {pipeline_mode = #tpu.pipeline_mode<synchronous>, transform_indices = @transform_1, window_bounds = array<i64: 8, 32>}, {pipeline_mode = #tpu.pipeline_mode<synchronous>, transform_indices = @transform_2, window_bounds = array<i64: 384, 32>}, {pipeline_mode = #tpu.pipeline_mode<synchronous>, transform_indices = @transform_3, window_bounds = array<i64: 2, 32, 96>}, {pipeline_mode = #tpu.pipeline_mode<synchronous>, transform_indices = @transform_4, window_bounds = array<i64: 2, 32, 32>}, {pipeline_mode = #tpu.pipeline_mode<synchronous>, transform_indices = @transform_5, window_bounds = array<i64: 2, 32, 128>}, {pipeline_mode = #tpu.pipeline_mode<synchronous>, transform_indices = @transform_6, window_bounds = array<i64: 2, 128, 32>}, {pipeline_mode = #tpu.pipeline_mode<synchronous>, transform_indices = @transform_7, window_bounds = array<i64: 2, 8, 128>}, {pipeline_mode = #tpu.pipeline_mode<synchronous>, transform_indices = @transform_8, window_bounds = array<i64: 160, 128>}, {pipeline_mode = #tpu.pipeline_mode<synchronous>, transform_indices = @transform_9, window_bounds = array<i64: 2, 128>}, {transform_indices = @transform_10, window_bounds = array<i64: 8, 128>}]} {
    %c0 = arith.constant 0 : index
    %c0_0 = arith.constant 0 : index
    %0 = vector.load %arg1[%c0, %c0_0] : memref<8x384xf32, #tpu.memory_space<vmem>>, vector<8x384xf32>
    %1 = arith.truncf %0 : vector<8x384xf32> to vector<8x384xbf16>
    %c0_1 = arith.constant 0 : index
    %c0_2 = arith.constant 0 : index
    %2 = vector.load %arg3[%c0_1, %c0_2] : memref<384x32xbf16, #tpu.memory_space<vmem>>, vector<384x32xbf16>
    %cst = arith.constant dense<0.000000e+00> : vector<8x32xf32>
    %3 = tpu.matmul %1, %2, %cst {dimension_numbers = #tpu.dot_dimension_numbers<[1], [0], [0], [1], [0, 0, 1, 1], [], []>} : vector<8x384xbf16>, vector<384x32xbf16>, vector<8x32xf32> -> vector<8x32xf32>
    %c0_3 = arith.constant 0 : index
    %c0_4 = arith.constant 0 : index
    %4 = vector.load %arg2[%c0_3, %c0_4] : memref<8x32xf32, #tpu.memory_space<vmem>>, vector<8x32xf32>
    %5 = arith.addf %3, %4 : vector<8x32xf32>
    %c0_5 = arith.constant 0 : index
    %c0_6 = arith.constant 0 : index
    %c0_7 = arith.constant 0 : index
    %6 = vector.load %arg8[%c0_5, %c0_6, %c0_7] : memref<2x8x128xf32, #tpu.memory_space<vmem>>, vector<1x8x128xf32>
    %7 = vector.shape_cast %6 : vector<1x8x128xf32> to vector<8x128xf32>
    %8 = vector.extract_strided_slice %7 {offsets = [0, 0], sizes = [1, 32], strides = [1, 1]} : vector<8x128xf32> to vector<1x32xf32>
    %9 = vector.extract_strided_slice %7 {offsets = [1, 0], sizes = [1, 32], strides = [1, 1]} : vector<8x128xf32> to vector<1x32xf32>
    %10 = vector.extract_strided_slice %7 {offsets = [2, 0], sizes = [1, 96], strides = [1, 1]} : vector<8x128xf32> to vector<1x96xf32>
    %11 = vector.extract_strided_slice %7 {offsets = [3, 0], sizes = [1, 32], strides = [1, 1]} : vector<8x128xf32> to vector<1x32xf32>
    %12 = vector.extract_strided_slice %7 {offsets = [4, 0], sizes = [1, 32], strides = [1, 1]} : vector<8x128xf32> to vector<1x32xf32>
    %13 = vector.extract_strided_slice %7 {offsets = [5, 0], sizes = [1, 32], strides = [1, 1]} : vector<8x128xf32> to vector<1x32xf32>
    %14 = vector.extract_strided_slice %7 {offsets = [6, 0], sizes = [1, 128], strides = [1, 1]} : vector<8x128xf32> to vector<1x128xf32>
    %15 = vector.extract_strided_slice %7 {offsets = [7, 0], sizes = [1, 32], strides = [1, 1]} : vector<8x128xf32> to vector<1x32xf32>
    %cst_8 = arith.constant dense<0.000000e+00> : vector<8xf32>
    %16 = vector.multi_reduction <add>, %5, %cst_8 [1] : vector<8x32xf32> to vector<8xf32>
    %17 = vector.shape_cast %16 : vector<8xf32> to vector<8x1xf32>
    %cst_9 = arith.constant 3.200000e+01 : f32
    %18 = vector.broadcast %cst_9 : f32 to vector<8x1xf32>
    %19 = arith.divf %17, %18 : vector<8x1xf32>
    %20 = vector.broadcast %19 : vector<8x1xf32> to vector<8x32xf32>
    %21 = arith.subf %5, %20 : vector<8x32xf32>
    %22 = arith.mulf %21, %21 : vector<8x32xf32>
    %cst_10 = arith.constant dense<0.000000e+00> : vector<8xf32>
    %23 = vector.multi_reduction <add>, %22, %cst_10 [1] : vector<8x32xf32> to vector<8xf32>
    %24 = vector.shape_cast %23 : vector<8xf32> to vector<8x1xf32>
    %cst_11 = arith.constant 3.200000e+01 : f32
    %25 = vector.broadcast %cst_11 : f32 to vector<8x1xf32>
    %26 = arith.divf %24, %25 : vector<8x1xf32>
    %cst_12 = arith.constant 9.99999996E-13 : f32
    %27 = vector.broadcast %cst_12 : f32 to vector<8x1xf32>
    %28 = arith.addf %26, %27 : vector<8x1xf32>
    %29 = math.rsqrt %28 : vector<8x1xf32>
    %30 = vector.broadcast %29 : vector<8x1xf32> to vector<8x32xf32>
    %31 = arith.mulf %21, %30 : vector<8x32xf32>
    %32 = vector.broadcast %8 : vector<1x32xf32> to vector<8x32xf32>
    %33 = arith.mulf %31, %32 : vector<8x32xf32>
    %34 = vector.broadcast %9 : vector<1x32xf32> to vector<8x32xf32>
    %35 = arith.addf %33, %34 : vector<8x32xf32>
    %36 = arith.truncf %35 : vector<8x32xf32> to vector<8x32xbf16>
    %c0_13 = arith.constant 0 : index
    %c0_14 = arith.constant 0 : index
    %c0_15 = arith.constant 0 : index
    %37 = vector.load %arg4[%c0_13, %c0_14, %c0_15] : memref<2x32x96xbf16, #tpu.memory_space<vmem>>, vector<1x32x96xbf16>
    %38 = vector.shape_cast %37 : vector<1x32x96xbf16> to vector<32x96xbf16>
    %cst_16 = arith.constant dense<0.000000e+00> : vector<8x96xf32>
    %39 = tpu.matmul %36, %38, %cst_16 {dimension_numbers = #tpu.dot_dimension_numbers<[1], [0], [0], [1], [0, 0, 1, 1], [], []>} : vector<8x32xbf16>, vector<32x96xbf16>, vector<8x96xf32> -> vector<8x96xf32>
    %40 = vector.broadcast %10 : vector<1x96xf32> to vector<8x96xf32>
    %41 = arith.addf %39, %40 : vector<8x96xf32>
    %42 = vector.extract_strided_slice %41 {offsets = [0, 0], sizes = [8, 32], strides = [1, 1]} : vector<8x96xf32> to vector<8x32xf32>
    %43 = vector.shape_cast %42 : vector<8x32xf32> to vector<8x4x8xf32>
    %44 = tpu.transpose %43, [1, 0, 2] : vector<8x4x8xf32> -> vector<4x8x8xf32>
    %cst_17 = arith.constant 0.353553385 : f32
    %45 = vector.broadcast %cst_17 : f32 to vector<4x8x8xf32>
    %46 = arith.mulf %44, %45 : vector<4x8x8xf32>
    %47 = vector.extract_strided_slice %41 {offsets = [0, 32], sizes = [8, 32], strides = [1, 1]} : vector<8x96xf32> to vector<8x32xf32>
    %48 = vector.shape_cast %47 : vector<8x32xf32> to vector<8x4x8xf32>
    %49 = tpu.transpose %48, [1, 0, 2] : vector<8x4x8xf32> -> vector<4x8x8xf32>
    %50 = vector.extract_strided_slice %41 {offsets = [0, 64], sizes = [8, 32], strides = [1, 1]} : vector<8x96xf32> to vector<8x32xf32>
    %51 = vector.shape_cast %50 : vector<8x32xf32> to vector<8x4x8xf32>
    %52 = tpu.transpose %51, [1, 0, 2] : vector<8x4x8xf32> -> vector<4x8x8xf32>
    "tpu.trace_start"() <{level = 10 : i32, message = "hqd,hkd->hqk"}> : () -> ()
    %cst_18 = arith.constant dense<0.000000e+00> : vector<4x8x8xf32>
    %53 = tpu.matmul %46, %49, %cst_18 {dimension_numbers = #tpu.dot_dimension_numbers<[2], [2], [1], [1], [0, 0, 0, 1, 1, 1], [0], [0]>} : vector<4x8x8xf32>, vector<4x8x8xf32>, vector<4x8x8xf32> -> vector<4x8x8xf32>
    "tpu.trace_stop"() : () -> ()
    %cst_19 = arith.constant dense<0xFF800000> : vector<4x8xf32>
    %54 = vector.multi_reduction <maximumf>, %53, %cst_19 [2] : vector<4x8x8xf32> to vector<4x8xf32>
    %55 = vector.shape_cast %54 : vector<4x8xf32> to vector<4x8x1xf32>
    %56 = vector.broadcast %55 : vector<4x8x1xf32> to vector<4x8x8xf32>
    %57 = arith.subf %53, %56 : vector<4x8x8xf32>
    %58 = math.exp %57 : vector<4x8x8xf32>
    %cst_20 = arith.constant dense<0.000000e+00> : vector<4x8xf32>
    %59 = vector.multi_reduction <add>, %58, %cst_20 [2] : vector<4x8x8xf32> to vector<4x8xf32>
    %60 = vector.shape_cast %59 : vector<4x8xf32> to vector<4x8x1xf32>
    %61 = tpu.reciprocal %60 {approx = true} : vector<4x8x1xf32> -> vector<4x8x1xf32>
    %62 = vector.broadcast %61 : vector<4x8x1xf32> to vector<4x8x8xf32>
    %63 = arith.mulf %58, %62 : vector<4x8x8xf32>
    "tpu.trace_start"() <{level = 10 : i32, message = "hqk,hkd->hqd"}> : () -> ()
    %cst_21 = arith.constant dense<0.000000e+00> : vector<4x8x8xf32>
    %64 = tpu.matmul %63, %52, %cst_21 {dimension_numbers = #tpu.dot_dimension_numbers<[2], [1], [1], [2], [0, 0, 0, 1, 1, 2], [0], [0]>} : vector<4x8x8xf32>, vector<4x8x8xf32>, vector<4x8x8xf32> -> vector<4x8x8xf32>
    "tpu.trace_stop"() : () -> ()
    %65 = tpu.transpose %64, [1, 0, 2] : vector<4x8x8xf32> -> vector<8x4x8xf32>
    %66 = vector.shape_cast %65 : vector<8x4x8xf32> to vector<8x32xf32>
    %67 = arith.truncf %66 : vector<8x32xf32> to vector<8x32xbf16>
    %c0_22 = arith.constant 0 : index
    %c0_23 = arith.constant 0 : index
    %c0_24 = arith.constant 0 : index
    %68 = vector.load %arg5[%c0_22, %c0_23, %c0_24] : memref<2x32x32xbf16, #tpu.memory_space<vmem>>, vector<1x32x32xbf16>
    %69 = vector.shape_cast %68 : vector<1x32x32xbf16> to vector<32x32xbf16>
    %cst_25 = arith.constant dense<0.000000e+00> : vector<8x32xf32>
    %70 = tpu.matmul %67, %69, %cst_25 {dimension_numbers = #tpu.dot_dimension_numbers<[1], [0], [0], [1], [0, 0, 1, 1], [], []>} : vector<8x32xbf16>, vector<32x32xbf16>, vector<8x32xf32> -> vector<8x32xf32>
    %71 = arith.addf %5, %70 : vector<8x32xf32>
    %72 = vector.broadcast %11 : vector<1x32xf32> to vector<8x32xf32>
    %73 = arith.addf %71, %72 : vector<8x32xf32>
    %cst_26 = arith.constant dense<0.000000e+00> : vector<8xf32>
    %74 = vector.multi_reduction <add>, %73, %cst_26 [1] : vector<8x32xf32> to vector<8xf32>
    %75 = vector.shape_cast %74 : vector<8xf32> to vector<8x1xf32>
    %cst_27 = arith.constant 3.200000e+01 : f32
    %76 = vector.broadcast %cst_27 : f32 to vector<8x1xf32>
    %77 = arith.divf %75, %76 : vector<8x1xf32>
    %78 = vector.broadcast %77 : vector<8x1xf32> to vector<8x32xf32>
    %79 = arith.subf %73, %78 : vector<8x32xf32>
    %80 = arith.mulf %79, %79 : vector<8x32xf32>
    %cst_28 = arith.constant dense<0.000000e+00> : vector<8xf32>
    %81 = vector.multi_reduction <add>, %80, %cst_28 [1] : vector<8x32xf32> to vector<8xf32>
    %82 = vector.shape_cast %81 : vector<8xf32> to vector<8x1xf32>
    %cst_29 = arith.constant 3.200000e+01 : f32
    %83 = vector.broadcast %cst_29 : f32 to vector<8x1xf32>
    %84 = arith.divf %82, %83 : vector<8x1xf32>
    %cst_30 = arith.constant 9.99999996E-13 : f32
    %85 = vector.broadcast %cst_30 : f32 to vector<8x1xf32>
    %86 = arith.addf %84, %85 : vector<8x1xf32>
    %87 = math.rsqrt %86 : vector<8x1xf32>
    %88 = vector.broadcast %87 : vector<8x1xf32> to vector<8x32xf32>
    %89 = arith.mulf %79, %88 : vector<8x32xf32>
    %90 = vector.broadcast %12 : vector<1x32xf32> to vector<8x32xf32>
    %91 = arith.mulf %89, %90 : vector<8x32xf32>
    %92 = vector.broadcast %13 : vector<1x32xf32> to vector<8x32xf32>
    %93 = arith.addf %91, %92 : vector<8x32xf32>
    %94 = arith.truncf %93 : vector<8x32xf32> to vector<8x32xbf16>
    %c0_31 = arith.constant 0 : index
    %c0_32 = arith.constant 0 : index
    %c0_33 = arith.constant 0 : index
    %95 = vector.load %arg6[%c0_31, %c0_32, %c0_33] : memref<2x32x128xbf16, #tpu.memory_space<vmem>>, vector<1x32x128xbf16>
    %96 = vector.shape_cast %95 : vector<1x32x128xbf16> to vector<32x128xbf16>
    %cst_34 = arith.constant dense<0.000000e+00> : vector<8x128xf32>
    %97 = tpu.matmul %94, %96, %cst_34 {dimension_numbers = #tpu.dot_dimension_numbers<[1], [0], [0], [1], [0, 0, 1, 1], [], []>} : vector<8x32xbf16>, vector<32x128xbf16>, vector<8x128xf32> -> vector<8x128xf32>
    %98 = vector.broadcast %14 : vector<1x128xf32> to vector<8x128xf32>
    %99 = arith.addf %97, %98 : vector<8x128xf32>
    %100 = arith.mulf %99, %99 : vector<8x128xf32>
    %101 = arith.mulf %99, %100 : vector<8x128xf32>
    %cst_35 = arith.constant 4.471500e-02 : f32
    %102 = vector.broadcast %cst_35 : f32 to vector<8x128xf32>
    %103 = arith.mulf %102, %101 : vector<8x128xf32>
    %104 = arith.addf %99, %103 : vector<8x128xf32>
    %cst_36 = arith.constant 0.797884583 : f32
    %105 = vector.broadcast %cst_36 : f32 to vector<8x128xf32>
    %106 = arith.mulf %105, %104 : vector<8x128xf32>
    %107 = math.tanh %106 : vector<8x128xf32>
    %cst_37 = arith.constant 1.000000e+00 : f32
    %108 = vector.broadcast %cst_37 : f32 to vector<8x128xf32>
    %109 = arith.addf %108, %107 : vector<8x128xf32>
    %cst_38 = arith.constant 5.000000e-01 : f32
    %110 = vector.broadcast %cst_38 : f32 to vector<8x128xf32>
    %111 = arith.mulf %110, %109 : vector<8x128xf32>
    %112 = arith.mulf %99, %111 : vector<8x128xf32>
    %113 = arith.truncf %112 : vector<8x128xf32> to vector<8x128xbf16>
    %c0_39 = arith.constant 0 : index
    %c0_40 = arith.constant 0 : index
    %c0_41 = arith.constant 0 : index
    %114 = vector.load %arg7[%c0_39, %c0_40, %c0_41] : memref<2x128x32xbf16, #tpu.memory_space<vmem>>, vector<1x128x32xbf16>
    %115 = vector.shape_cast %114 : vector<1x128x32xbf16> to vector<128x32xbf16>
    %cst_42 = arith.constant dense<0.000000e+00> : vector<8x32xf32>
    %116 = tpu.matmul %113, %115, %cst_42 {dimension_numbers = #tpu.dot_dimension_numbers<[1], [0], [0], [1], [0, 0, 1, 1], [], []>} : vector<8x128xbf16>, vector<128x32xbf16>, vector<8x32xf32> -> vector<8x32xf32>
    %117 = arith.addf %73, %116 : vector<8x32xf32>
    %118 = vector.broadcast %15 : vector<1x32xf32> to vector<8x32xf32>
    %119 = arith.addf %117, %118 : vector<8x32xf32>
    %c1 = arith.constant 1 : index
    %c0_43 = arith.constant 0 : index
    %c0_44 = arith.constant 0 : index
    %120 = vector.load %arg8[%c1, %c0_43, %c0_44] : memref<2x8x128xf32, #tpu.memory_space<vmem>>, vector<1x8x128xf32>
    %121 = vector.shape_cast %120 : vector<1x8x128xf32> to vector<8x128xf32>
    %122 = vector.extract_strided_slice %121 {offsets = [0, 0], sizes = [1, 32], strides = [1, 1]} : vector<8x128xf32> to vector<1x32xf32>
    %123 = vector.extract_strided_slice %121 {offsets = [1, 0], sizes = [1, 32], strides = [1, 1]} : vector<8x128xf32> to vector<1x32xf32>
    %124 = vector.extract_strided_slice %121 {offsets = [2, 0], sizes = [1, 96], strides = [1, 1]} : vector<8x128xf32> to vector<1x96xf32>
    %125 = vector.extract_strided_slice %121 {offsets = [3, 0], sizes = [1, 32], strides = [1, 1]} : vector<8x128xf32> to vector<1x32xf32>
    %126 = vector.extract_strided_slice %121 {offsets = [4, 0], sizes = [1, 32], strides = [1, 1]} : vector<8x128xf32> to vector<1x32xf32>
    %127 = vector.extract_strided_slice %121 {offsets = [5, 0], sizes = [1, 32], strides = [1, 1]} : vector<8x128xf32> to vector<1x32xf32>
    %128 = vector.extract_strided_slice %121 {offsets = [6, 0], sizes = [1, 128], strides = [1, 1]} : vector<8x128xf32> to vector<1x128xf32>
    %129 = vector.extract_strided_slice %121 {offsets = [7, 0], sizes = [1, 32], strides = [1, 1]} : vector<8x128xf32> to vector<1x32xf32>
    %cst_45 = arith.constant dense<0.000000e+00> : vector<8xf32>
    %130 = vector.multi_reduction <add>, %119, %cst_45 [1] : vector<8x32xf32> to vector<8xf32>
    %131 = vector.shape_cast %130 : vector<8xf32> to vector<8x1xf32>
    %cst_46 = arith.constant 3.200000e+01 : f32
    %132 = vector.broadcast %cst_46 : f32 to vector<8x1xf32>
    %133 = arith.divf %131, %132 : vector<8x1xf32>
    %134 = vector.broadcast %133 : vector<8x1xf32> to vector<8x32xf32>
    %135 = arith.subf %119, %134 : vector<8x32xf32>
    %136 = arith.mulf %135, %135 : vector<8x32xf32>
    %cst_47 = arith.constant dense<0.000000e+00> : vector<8xf32>
    %137 = vector.multi_reduction <add>, %136, %cst_47 [1] : vector<8x32xf32> to vector<8xf32>
    %138 = vector.shape_cast %137 : vector<8xf32> to vector<8x1xf32>
    %cst_48 = arith.constant 3.200000e+01 : f32
    %139 = vector.broadcast %cst_48 : f32 to vector<8x1xf32>
    %140 = arith.divf %138, %139 : vector<8x1xf32>
    %cst_49 = arith.constant 9.99999996E-13 : f32
    %141 = vector.broadcast %cst_49 : f32 to vector<8x1xf32>
    %142 = arith.addf %140, %141 : vector<8x1xf32>
    %143 = math.rsqrt %142 : vector<8x1xf32>
    %144 = vector.broadcast %143 : vector<8x1xf32> to vector<8x32xf32>
    %145 = arith.mulf %135, %144 : vector<8x32xf32>
    %146 = vector.broadcast %122 : vector<1x32xf32> to vector<8x32xf32>
    %147 = arith.mulf %145, %146 : vector<8x32xf32>
    %148 = vector.broadcast %123 : vector<1x32xf32> to vector<8x32xf32>
    %149 = arith.addf %147, %148 : vector<8x32xf32>
    %150 = arith.truncf %149 : vector<8x32xf32> to vector<8x32xbf16>
    %c1_50 = arith.constant 1 : index
    %c0_51 = arith.constant 0 : index
    %c0_52 = arith.constant 0 : index
    %151 = vector.load %arg4[%c1_50, %c0_51, %c0_52] : memref<2x32x96xbf16, #tpu.memory_space<vmem>>, vector<1x32x96xbf16>
    %152 = vector.shape_cast %151 : vector<1x32x96xbf16> to vector<32x96xbf16>
    %cst_53 = arith.constant dense<0.000000e+00> : vector<8x96xf32>
    %153 = tpu.matmul %150, %152, %cst_53 {dimension_numbers = #tpu.dot_dimension_numbers<[1], [0], [0], [1], [0, 0, 1, 1], [], []>} : vector<8x32xbf16>, vector<32x96xbf16>, vector<8x96xf32> -> vector<8x96xf32>
    %154 = vector.broadcast %124 : vector<1x96xf32> to vector<8x96xf32>
    %155 = arith.addf %153, %154 : vector<8x96xf32>
    %156 = vector.extract_strided_slice %155 {offsets = [0, 0], sizes = [8, 32], strides = [1, 1]} : vector<8x96xf32> to vector<8x32xf32>
    %157 = vector.shape_cast %156 : vector<8x32xf32> to vector<8x4x8xf32>
    %158 = tpu.transpose %157, [1, 0, 2] : vector<8x4x8xf32> -> vector<4x8x8xf32>
    %cst_54 = arith.constant 0.353553385 : f32
    %159 = vector.broadcast %cst_54 : f32 to vector<4x8x8xf32>
    %160 = arith.mulf %158, %159 : vector<4x8x8xf32>
    %161 = vector.extract_strided_slice %155 {offsets = [0, 32], sizes = [8, 32], strides = [1, 1]} : vector<8x96xf32> to vector<8x32xf32>
    %162 = vector.shape_cast %161 : vector<8x32xf32> to vector<8x4x8xf32>
    %163 = tpu.transpose %162, [1, 0, 2] : vector<8x4x8xf32> -> vector<4x8x8xf32>
    %164 = vector.extract_strided_slice %155 {offsets = [0, 64], sizes = [8, 32], strides = [1, 1]} : vector<8x96xf32> to vector<8x32xf32>
    %165 = vector.shape_cast %164 : vector<8x32xf32> to vector<8x4x8xf32>
    %166 = tpu.transpose %165, [1, 0, 2] : vector<8x4x8xf32> -> vector<4x8x8xf32>
    "tpu.trace_start"() <{level = 10 : i32, message = "hqd,hkd->hqk"}> : () -> ()
    %cst_55 = arith.constant dense<0.000000e+00> : vector<4x8x8xf32>
    %167 = tpu.matmul %160, %163, %cst_55 {dimension_numbers = #tpu.dot_dimension_numbers<[2], [2], [1], [1], [0, 0, 0, 1, 1, 1], [0], [0]>} : vector<4x8x8xf32>, vector<4x8x8xf32>, vector<4x8x8xf32> -> vector<4x8x8xf32>
    "tpu.trace_stop"() : () -> ()
    %cst_56 = arith.constant dense<0xFF800000> : vector<4x8xf32>
    %168 = vector.multi_reduction <maximumf>, %167, %cst_56 [2] : vector<4x8x8xf32> to vector<4x8xf32>
    %169 = vector.shape_cast %168 : vector<4x8xf32> to vector<4x8x1xf32>
    %170 = vector.broadcast %169 : vector<4x8x1xf32> to vector<4x8x8xf32>
    %171 = arith.subf %167, %170 : vector<4x8x8xf32>
    %172 = math.exp %171 : vector<4x8x8xf32>
    %cst_57 = arith.constant dense<0.000000e+00> : vector<4x8xf32>
    %173 = vector.multi_reduction <add>, %172, %cst_57 [2] : vector<4x8x8xf32> to vector<4x8xf32>
    %174 = vector.shape_cast %173 : vector<4x8xf32> to vector<4x8x1xf32>
    %175 = tpu.reciprocal %174 {approx = true} : vector<4x8x1xf32> -> vector<4x8x1xf32>
    %176 = vector.broadcast %175 : vector<4x8x1xf32> to vector<4x8x8xf32>
    %177 = arith.mulf %172, %176 : vector<4x8x8xf32>
    "tpu.trace_start"() <{level = 10 : i32, message = "hqk,hkd->hqd"}> : () -> ()
    %cst_58 = arith.constant dense<0.000000e+00> : vector<4x8x8xf32>
    %178 = tpu.matmul %177, %166, %cst_58 {dimension_numbers = #tpu.dot_dimension_numbers<[2], [1], [1], [2], [0, 0, 0, 1, 1, 2], [0], [0]>} : vector<4x8x8xf32>, vector<4x8x8xf32>, vector<4x8x8xf32> -> vector<4x8x8xf32>
    "tpu.trace_stop"() : () -> ()
    %179 = tpu.transpose %178, [1, 0, 2] : vector<4x8x8xf32> -> vector<8x4x8xf32>
    %180 = vector.shape_cast %179 : vector<8x4x8xf32> to vector<8x32xf32>
    %181 = arith.truncf %180 : vector<8x32xf32> to vector<8x32xbf16>
    %c1_59 = arith.constant 1 : index
    %c0_60 = arith.constant 0 : index
    %c0_61 = arith.constant 0 : index
    %182 = vector.load %arg5[%c1_59, %c0_60, %c0_61] : memref<2x32x32xbf16, #tpu.memory_space<vmem>>, vector<1x32x32xbf16>
    %183 = vector.shape_cast %182 : vector<1x32x32xbf16> to vector<32x32xbf16>
    %cst_62 = arith.constant dense<0.000000e+00> : vector<8x32xf32>
    %184 = tpu.matmul %181, %183, %cst_62 {dimension_numbers = #tpu.dot_dimension_numbers<[1], [0], [0], [1], [0, 0, 1, 1], [], []>} : vector<8x32xbf16>, vector<32x32xbf16>, vector<8x32xf32> -> vector<8x32xf32>
    %185 = arith.addf %119, %184 : vector<8x32xf32>
    %186 = vector.broadcast %125 : vector<1x32xf32> to vector<8x32xf32>
    %187 = arith.addf %185, %186 : vector<8x32xf32>
    %cst_63 = arith.constant dense<0.000000e+00> : vector<8xf32>
    %188 = vector.multi_reduction <add>, %187, %cst_63 [1] : vector<8x32xf32> to vector<8xf32>
    %189 = vector.shape_cast %188 : vector<8xf32> to vector<8x1xf32>
    %cst_64 = arith.constant 3.200000e+01 : f32
    %190 = vector.broadcast %cst_64 : f32 to vector<8x1xf32>
    %191 = arith.divf %189, %190 : vector<8x1xf32>
    %192 = vector.broadcast %191 : vector<8x1xf32> to vector<8x32xf32>
    %193 = arith.subf %187, %192 : vector<8x32xf32>
    %194 = arith.mulf %193, %193 : vector<8x32xf32>
    %cst_65 = arith.constant dense<0.000000e+00> : vector<8xf32>
    %195 = vector.multi_reduction <add>, %194, %cst_65 [1] : vector<8x32xf32> to vector<8xf32>
    %196 = vector.shape_cast %195 : vector<8xf32> to vector<8x1xf32>
    %cst_66 = arith.constant 3.200000e+01 : f32
    %197 = vector.broadcast %cst_66 : f32 to vector<8x1xf32>
    %198 = arith.divf %196, %197 : vector<8x1xf32>
    %cst_67 = arith.constant 9.99999996E-13 : f32
    %199 = vector.broadcast %cst_67 : f32 to vector<8x1xf32>
    %200 = arith.addf %198, %199 : vector<8x1xf32>
    %201 = math.rsqrt %200 : vector<8x1xf32>
    %202 = vector.broadcast %201 : vector<8x1xf32> to vector<8x32xf32>
    %203 = arith.mulf %193, %202 : vector<8x32xf32>
    %204 = vector.broadcast %126 : vector<1x32xf32> to vector<8x32xf32>
    %205 = arith.mulf %203, %204 : vector<8x32xf32>
    %206 = vector.broadcast %127 : vector<1x32xf32> to vector<8x32xf32>
    %207 = arith.addf %205, %206 : vector<8x32xf32>
    %208 = arith.truncf %207 : vector<8x32xf32> to vector<8x32xbf16>
    %c1_68 = arith.constant 1 : index
    %c0_69 = arith.constant 0 : index
    %c0_70 = arith.constant 0 : index
    %209 = vector.load %arg6[%c1_68, %c0_69, %c0_70] : memref<2x32x128xbf16, #tpu.memory_space<vmem>>, vector<1x32x128xbf16>
    %210 = vector.shape_cast %209 : vector<1x32x128xbf16> to vector<32x128xbf16>
    %cst_71 = arith.constant dense<0.000000e+00> : vector<8x128xf32>
    %211 = tpu.matmul %208, %210, %cst_71 {dimension_numbers = #tpu.dot_dimension_numbers<[1], [0], [0], [1], [0, 0, 1, 1], [], []>} : vector<8x32xbf16>, vector<32x128xbf16>, vector<8x128xf32> -> vector<8x128xf32>
    %212 = vector.broadcast %128 : vector<1x128xf32> to vector<8x128xf32>
    %213 = arith.addf %211, %212 : vector<8x128xf32>
    %214 = arith.mulf %213, %213 : vector<8x128xf32>
    %215 = arith.mulf %213, %214 : vector<8x128xf32>
    %cst_72 = arith.constant 4.471500e-02 : f32
    %216 = vector.broadcast %cst_72 : f32 to vector<8x128xf32>
    %217 = arith.mulf %216, %215 : vector<8x128xf32>
    %218 = arith.addf %213, %217 : vector<8x128xf32>
    %cst_73 = arith.constant 0.797884583 : f32
    %219 = vector.broadcast %cst_73 : f32 to vector<8x128xf32>
    %220 = arith.mulf %219, %218 : vector<8x128xf32>
    %221 = math.tanh %220 : vector<8x128xf32>
    %cst_74 = arith.constant 1.000000e+00 : f32
    %222 = vector.broadcast %cst_74 : f32 to vector<8x128xf32>
    %223 = arith.addf %222, %221 : vector<8x128xf32>
    %cst_75 = arith.constant 5.000000e-01 : f32
    %224 = vector.broadcast %cst_75 : f32 to vector<8x128xf32>
    %225 = arith.mulf %224, %223 : vector<8x128xf32>
    %226 = arith.mulf %213, %225 : vector<8x128xf32>
    %227 = arith.truncf %226 : vector<8x128xf32> to vector<8x128xbf16>
    %c1_76 = arith.constant 1 : index
    %c0_77 = arith.constant 0 : index
    %c0_78 = arith.constant 0 : index
    %228 = vector.load %arg7[%c1_76, %c0_77, %c0_78] : memref<2x128x32xbf16, #tpu.memory_space<vmem>>, vector<1x128x32xbf16>
    %229 = vector.shape_cast %228 : vector<1x128x32xbf16> to vector<128x32xbf16>
    %cst_79 = arith.constant dense<0.000000e+00> : vector<8x32xf32>
    %230 = tpu.matmul %227, %229, %cst_79 {dimension_numbers = #tpu.dot_dimension_numbers<[1], [0], [0], [1], [0, 0, 1, 1], [], []>} : vector<8x128xbf16>, vector<128x32xbf16>, vector<8x32xf32> -> vector<8x32xf32>
    %231 = arith.addf %187, %230 : vector<8x32xf32>
    %232 = vector.broadcast %129 : vector<1x32xf32> to vector<8x32xf32>
    %233 = arith.addf %231, %232 : vector<8x32xf32>
    %c0_80 = arith.constant 0 : index
    %c0_81 = arith.constant 0 : index
    %234 = vector.load %arg9[%c0_80, %c0_81] : memref<160x128xbf16, #tpu.memory_space<vmem>>, vector<32x128xbf16>
    %c32 = arith.constant 32 : index
    %c0_82 = arith.constant 0 : index
    %235 = vector.load %arg9[%c32, %c0_82] : memref<160x128xbf16, #tpu.memory_space<vmem>>, vector<128x128xbf16>
    %c0_83 = arith.constant 0 : index
    %c0_84 = arith.constant 0 : index
    %236 = vector.load %arg10[%c0_83, %c0_84] : memref<2x128xf32, #tpu.memory_space<vmem>>, vector<1x128xf32>
    %c1_85 = arith.constant 1 : index
    %c0_86 = arith.constant 0 : index
    %237 = vector.load %arg10[%c1_85, %c0_86] : memref<2x128xf32, #tpu.memory_space<vmem>>, vector<1x128xf32>
    %238 = arith.truncf %233 : vector<8x32xf32> to vector<8x32xbf16>
    %cst_87 = arith.constant dense<0.000000e+00> : vector<8x128xf32>
    %239 = tpu.matmul %238, %234, %cst_87 {dimension_numbers = #tpu.dot_dimension_numbers<[1], [0], [0], [1], [0, 0, 1, 1], [], []>} : vector<8x32xbf16>, vector<32x128xbf16>, vector<8x128xf32> -> vector<8x128xf32>
    %240 = vector.broadcast %236 : vector<1x128xf32> to vector<8x128xf32>
    %241 = arith.addf %239, %240 : vector<8x128xf32>
    %cst_88 = arith.constant 0.000000e+00 : f32
    %242 = vector.broadcast %cst_88 : f32 to vector<8x128xf32>
    %243 = arith.maximumf %241, %242 : vector<8x128xf32>
    %244 = arith.truncf %243 : vector<8x128xf32> to vector<8x128xbf16>
    %cst_89 = arith.constant dense<0.000000e+00> : vector<8x128xf32>
    %245 = tpu.matmul %244, %235, %cst_89 {dimension_numbers = #tpu.dot_dimension_numbers<[1], [0], [0], [1], [0, 0, 1, 1], [], []>} : vector<8x128xbf16>, vector<128x128xbf16>, vector<8x128xf32> -> vector<8x128xf32>
    %246 = vector.broadcast %237 : vector<1x128xf32> to vector<8x128xf32>
    %247 = arith.addf %245, %246 : vector<8x128xf32>
    %c0_90 = arith.constant 0 : index
    %c0_91 = arith.constant 0 : index
    %248 = vector.load %arg11[%c0_90, %c0_91] : memref<8x128xf32, #tpu.memory_space<vmem>>, vector<8x128xf32>
    tpu.vector_store %arg11[%c0_90, %c0_91], %247 {strides = array<i32>} : memref<8x128xf32, #tpu.memory_space<vmem>>, vector<8x128xf32>,
    return
  }
  func.func @transform_0(%arg0: i32) -> (i32, i32) {
    %c0_i32 = arith.constant 0 : i32
    %c0_i32_0 = arith.constant 0 : i32
    return %arg0, %c0_i32 : i32, i32
  }
  func.func @transform_1(%arg0: i32) -> (i32, i32) {
    %c0_i32 = arith.constant 0 : i32
    %c0_i32_0 = arith.constant 0 : i32
    %c0_i32_1 = arith.constant 0 : i32
    return %c0_i32, %c0_i32_0 : i32, i32
  }
  func.func @transform_2(%arg0: i32) -> (i32, i32) {
    %c0_i32 = arith.constant 0 : i32
    %c0_i32_0 = arith.constant 0 : i32
    %c0_i32_1 = arith.constant 0 : i32
    return %c0_i32, %c0_i32_0 : i32, i32
  }
  func.func @transform_3(%arg0: i32) -> (i32, i32, i32) {
    %c0_i32 = arith.constant 0 : i32
    %c0_i32_0 = arith.constant 0 : i32
    %c0_i32_1 = arith.constant 0 : i32
    %c0_i32_2 = arith.constant 0 : i32
    return %c0_i32, %c0_i32_0, %c0_i32_1 : i32, i32, i32
  }
  func.func @transform_4(%arg0: i32) -> (i32, i32, i32) {
    %c0_i32 = arith.constant 0 : i32
    %c0_i32_0 = arith.constant 0 : i32
    %c0_i32_1 = arith.constant 0 : i32
    %c0_i32_2 = arith.constant 0 : i32
    return %c0_i32, %c0_i32_0, %c0_i32_1 : i32, i32, i32
  }
  func.func @transform_5(%arg0: i32) -> (i32, i32, i32) {
    %c0_i32 = arith.constant 0 : i32
    %c0_i32_0 = arith.constant 0 : i32
    %c0_i32_1 = arith.constant 0 : i32
    %c0_i32_2 = arith.constant 0 : i32
    return %c0_i32, %c0_i32_0, %c0_i32_1 : i32, i32, i32
  }
  func.func @transform_6(%arg0: i32) -> (i32, i32, i32) {
    %c0_i32 = arith.constant 0 : i32
    %c0_i32_0 = arith.constant 0 : i32
    %c0_i32_1 = arith.constant 0 : i32
    %c0_i32_2 = arith.constant 0 : i32
    return %c0_i32, %c0_i32_0, %c0_i32_1 : i32, i32, i32
  }
  func.func @transform_7(%arg0: i32) -> (i32, i32, i32) {
    %c0_i32 = arith.constant 0 : i32
    %c0_i32_0 = arith.constant 0 : i32
    %c0_i32_1 = arith.constant 0 : i32
    %c0_i32_2 = arith.constant 0 : i32
    return %c0_i32, %c0_i32_0, %c0_i32_1 : i32, i32, i32
  }
  func.func @transform_8(%arg0: i32) -> (i32, i32) {
    %c0_i32 = arith.constant 0 : i32
    %c0_i32_0 = arith.constant 0 : i32
    %c0_i32_1 = arith.constant 0 : i32
    return %c0_i32, %c0_i32_0 : i32, i32
  }
  func.func @transform_9(%arg0: i32) -> (i32, i32) {
    %c0_i32 = arith.constant 0 : i32
    %c0_i32_0 = arith.constant 0 : i32
    %c0_i32_1 = arith.constant 0 : i32
    return %c0_i32, %c0_i32_0 : i32, i32
  }
  func.func @transform_10(%arg0: i32) -> (i32, i32) {
    %c0_i32 = arith.constant 0 : i32
    %c0_i32_0 = arith.constant 0 : i32
    return %arg0, %c0_i32 : i32, i32
  }
}

</mosaic_0001>

<bundles_post_ra>
// kernel: videomae_regressor.1
= control target key start
LH: loop header
LB: loop body
LE: loop exit
PB: predicated region body
PF: predicated region fallthrough
CT: control target
= control target key end

     0   :  { %s3285_s13 = smov 0   ;;  %s4068_s0 = inlined_call_operand.vmem [shape: f32[16,384], index: 0, kind: input, shape index: {}]   ;;  %s4069_s1 = inlined_call_operand.vmem [shape: f32[8,32], index: 1, kind: input, shape index: {}]   ;;  %s4070_s2 = inlined_call_operand.vmem [shape: bf16[384,32], index: 2, kind: input, shape index: {}]   ;;  %s4071_s3 = inlined_call_operand.vmem [shape: bf16[2,32,96], index: 3, kind: input, shape index: {}]   ;;  %s4072_s4 = inlined_call_operand.vmem [shape: bf16[2,32,32], index: 4, kind: input, shape index: {}]   ;;  %s4073_s5 = inlined_call_operand.vmem [shape: bf16[2,32,128], index: 5, kind: input, shape index: {}]   ;;  %s4074_s6 = inlined_call_operand.vmem [shape: bf16[2,128,32], index: 6, kind: input, shape index: {}]   ;;  %s4075_s7 = inlined_call_operand.vmem [shape: f32[2,8,128], index: 7, kind: input, shape index: {}]   ;;  %s4076_s8 = inlined_call_operand.vmem [shape: bf16[160,128], index: 8, kind: input, shape index: {}]   ;;  %s4077_s9 = inlined_call_operand.vmem [shape: f32[2,128], index: 9, kind: input, shape index: {}]   ;;  %s4078_s10 = inlined_call_operand.vmem [shape: f32[16,128], index: 10, kind: output, shape index: {}]  }
   0x1 LB: > { %s2744_s14 = sadd.s32 4294967295, %s3217_s13   ;;  %p2748_p0 = scmp.ge.s32.totalorder %s3217_s13, 1  ;;  %s3217_s13 = sphi %s3285_s13, %s20_s13  }
   0x2   : > { %p312_p1 = scmp.lt.s32.totalorder %s3217_s13, 3 }
   0x4   : > { %p313_p2 = pnand %p2748_p0, %p312_p1 }
   0x5   : > { %p349_p3 = scmp.lt.s32.totalorder (!%p313_p2), %s2744_s14, 1  ;;  %s3220_s21 = smov (!%p313_p2), 104  }
   0x6   : > { %316 = sbr.rel (%p313_p2) target bundleno = 4509 (0x119d), region = 60  ;;  %s3221_s22 = smov (!%p313_p2), 120  }
   0x7   : > { %s3222_s23 = smov (!%p313_p2), 96   ;;  %s3226_s25 = smov (!%p313_p2), 64  }
   0x8   : > { %s3227_s26 = smov (!%p313_p2), 16   ;;  %s3228_s27 = smov (!%p313_p2), 8  }
   0x9   : > { %s3229_s28 = smov (!%p313_p2), 24  }
   0xb   : > { %v3068_v0 = vld [vmem:[%s4070_s2 + $0x38] sm:$0xff]  ;;  %v3067_v3 = vld [vmem:[%s4070_s2 + $0x30] sm:$0xff]  ;;  %v3066_v6 = vld [vmem:[%s4070_s2 + $0x28] sm:$0xff]  ;;  %s4080_s14 = smov (!%p349_p3, %s2744_s14), 1  ;;  %vm598_vm0 = vcmask 261120   ;;  %v3219_v41 = vmov 32.0  }
   0xc   : > { %v3076_v1 = vld [vmem:[%s4070_s2 + $0x78] sm:$0xff]  ;;  %558 = vmatpush.bf16.msra.mxu0 %v3068_v0  ;;  %v3075_v4 = vld [vmem:[%s4070_s2 + $0x70] sm:$0xff]  ;;  %v3074_v7 = vld [vmem:[%s4070_s2 + $0x68] sm:$0xff]  ;;  %s3123_s15 = smul.u32 24, %s4080_s14  ;;  %3165 = vrcp.f32 %v3219_v41  ;;  %vm677_vm5 = vcmask 1047556   ;;  %vm1035_vm6 = vcmask 64512  }
   0xd   : > { %v3084_v2 = vld [vmem:[%s4070_s2 + $0xb8] sm:$0xff]  ;;  %571 = vmatpush.bf16.msra.mxu1 %v3076_v1  ;;  %v3083_v5 = vld [vmem:[%s4070_s2 + $0xb0] sm:$0xff]  ;;  %v3082_v8 = vld [vmem:[%s4070_s2 + $0xa8] sm:$0xff]  ;;  %vm1399_vm7 = vcmask 130048   ;;  %vm1401_vm8 = vcmask 195584   ;;  %s2750_s11 = sshll.u32 %s4080_s14, 3 }
   0xe   : > { %584 = vmatpush.bf16.msra.mxu2 %v3084_v2  ;;  %v3065_v9 = vld [vmem:[%s4070_s2 + $0x20] sm:$0xff]  ;;  %v3064_v12 = vld [vmem:[%s4070_s2 + $0x18] sm:$0xff]  ;;  %v3063_v15 = vld [vmem:[%s4070_s2 + $0x10] sm:$0xff]  ;;  %s353_s24 = scalar_lea.vmem %s4068_s0, %s3123_s15  ;;  %s357_s18 = scalar_lea.vmem %s4078_s10, %s2750_s11 }
   0xf   : > { %v3073_v10 = vld [vmem:[%s4070_s2 + $0x60] sm:$0xff]  ;;  %v3072_v13 = vld [vmem:[%s4070_s2 + $0x58] sm:$0xff]  ;;  %v3071_v16 = vld [vmem:[%s4070_s2 + $0x50] sm:$0xff] }
  0x10   : > { %559 = vmatpush.bf16.msra.mxu0 %v3067_v3  ;;  %v3081_v11 = vld [vmem:[%s4070_s2 + $0xa0] sm:$0xff]  ;;  %v3080_v14 = vld [vmem:[%s4070_s2 + $0x98] sm:$0xff]  ;;  %v3079_v17 = vld [vmem:[%s4070_s2 + $0x90] sm:$0xff] }
  0x11   : > { %572 = vmatpush.bf16.msra.mxu1 %v3075_v4  ;;  %v3062_v18 = vld [vmem:[%s4070_s2 + $0x8] sm:$0xff]  ;;  %v3061_v21 = vld [vmem:[%s4070_s2] sm:$0xff]  ;;  %v361_v26 = vld [vmem:[%s353_s24 + $0x10] sm:$0xff] }
  0x12   : > { %585 = vmatpush.bf16.msra.mxu2 %v3083_v5  ;;  %v3070_v19 = vld [vmem:[%s4070_s2 + $0x48] sm:$0xff]  ;;  %v3069_v22 = vld [vmem:[%s4070_s2 + $0x40] sm:$0xff]  ;;  %v364_v29 = vpack.c.bf16 %v361_v26, %v361_v26  ;;  %v3166_v42 = vpop.eup %3165 }
  0x13   : > { %v3078_v20 = vld [vmem:[%s4070_s2 + $0x88] sm:$0xff]  ;;  %v359_v23 = vld [vmem:[%s353_s24] sm:$0xff]  ;;  %v603_v43 = vmul.f32 32.0, %v3166_v42  ;;  %vm607_vm1 = vweird.f32 %v3166_v42 }
  0x14   : > { %560 = vmatpush.bf16.msra.mxu0 %v3066_v6  ;;  %v360_v24 = vld [vmem:[%s353_s24 + $0x8] sm:$0xff]  ;;  %v3077_v25 = vld [vmem:[%s4070_s2 + $0x80] sm:$0xff]  ;;  %v362_v27 = vpack.c.bf16 %v359_v23, %v359_v23  ;;  %s3223_s24 = smov 112  }
  0x15   : > { %573 = vmatpush.bf16.msra.mxu1 %v3074_v7  ;;  %v363_v28 = vpack.c.bf16 %v360_v24, %v360_v24  ;;  %v413_v30 = vld [vmem:[%s4069_s1] sm:$0xff]  ;;  %v604_v44 = vsub.f32 1.0, %v603_v43  ;;  %v3086_v53 = vld [vmem:[%s4071_s3 + $0x8] sm:$0xff] }
  0x16   : > { %586 = vmatpush.bf16.msra.mxu2 %v3082_v8  ;;  %659 = vmatpush.bf16.msra.mxu3 %v3086_v53  ;;  %v3085_v54 = vld [vmem:[%s4071_s3] sm:$0xff] }
  0x17   : > { %v605_v45 = vmul.f32 %v3166_v42, %v604_v44  ;;  %v3397_v63 = vld [vmem:[%s4075_s7] sm:$0xff] }
  0x18   : > { %561 = vmatpush.bf16.msra.mxu0 %v3065_v9  ;;  %v628_v1 = vperm.slane %v3397_v63, 0  ;;  %v630_v4 = vperm.slane %v3397_v63, 1  ;;  %v637_v8 = vperm.slane %v3397_v63, 2 }
  0x19   : > { %574 = vmatpush.bf16.msra.mxu1 %v3073_v10  ;;  %v606_v46 = vadd.f32 %v3166_v42, %v605_v45 }
  0x1a   : > { %587 = vmatpush.bf16.msra.mxu2 %v3081_v11  ;;  %660 = vmatpush.bf16.msra.mxu3 %v3085_v54 }
  0x1b   : > { %v3382_v47 = vsel %vm607_vm1, %v3166_v42, %v606_v46 }
  0x1c   : > { %562 = vmatpush.bf16.msra.mxu0 %v3064_v12 }
  0x1d   : > { %575 = vmatpush.bf16.msra.mxu1 %v3072_v13 }
  0x1e   : > { %588 = vmatpush.bf16.msra.mxu2 %v3080_v14  ;;  %v3224_v14 = vmov 1983009808  }
  0x20   : > { %563 = vmatpush.bf16.msra.mxu0 %v3063_v15  ;;  %v682_v15 = vunpack.c.l.s4 %v3224_v14 }
  0x21   : > { %576 = vmatpush.bf16.msra.mxu1 %v3071_v16 }
  0x22   : > { %589 = vmatpush.bf16.msra.mxu2 %v3079_v17 }
  0x24   : > { %564 = vmatpush.bf16.msra.mxu0 %v3062_v18 }
  0x25   : > { %577 = vmatpush.bf16.msra.mxu1 %v3070_v19 }
  0x26   : > { %590 = vmatpush.bf16.msra.mxu2 %v3078_v20  ;;  %v3427_v20 = vunpack.c.0.s8 %v682_v15 }
  0x28   : > { %565 = vmatpush.bf16.msra.mxu0 %v3061_v21  ;;  %v3225_v21 = vmov 1934713408  }
  0x29   : > { %578 = vmatpush.bf16.msra.mxu1 %v3069_v22  ;;  %v706_v22 = vunpack.c.l.s4 %v3225_v21 }
  0x2a   : > { %591 = vmatpush.bf16.msra.mxu2 %v3077_v25 }
  0x2b   : > { %566 = vmatmul.bf16.vlgmr.msra.gmra.mxu0 %v362_v27  ;;  %v3434_v27 = vunpack.c.0.s8 %v706_v22 }
  0x2c   : > { %579 = vmatmul.bf16.vlgmr.msra.gmra.mxu1 %v363_v28 }
  0x2d   : > { %592 = vmatmul.bf16.vlgmr.msra.gmra.mxu2 %v364_v29 }
  0xa8   : > { %v567_v31 = vpop.f32.mrf.mxu0 }
  0xa9   : > { %v580_v32 = vpop.f32.mrf.mxu1  ;;  %v568_v33 = vadd.f32 %v567_v31, %v413_v30 }
  0xab   : > { %v581_v34 = vadd.f32 %v580_v32, %v568_v33 }
  0xb0   : > { %v593_v35 = vpop.f32.mrf.mxu2  ;;  %v569_v37 = vpop.f32.mrf.mxu0 }
  0xb1   : > { %v3378_v36 = vadd.f32 %v593_v35, %v581_v34  ;;  %v582_v38 = vpop.f32.mrf.mxu1 }
  0xb3   : > { %v599_v39 = vsel %vm598_vm0, %v3378_v36, 0.0 }
  0xb4   : > { %600 = vadd.xlane.f32.xlu0 %v599_v39 }
  0xb8   : > { %v595_v40 = vpop.f32.mrf.mxu2 }
 0x127   : > { %v601_v48 = vpop.xlane.xlu0 %600 }
 0x128   : > { %v609_v49 = vmul.f32 %v3382_v47, %v601_v48 }
 0x12a   : > { %v610_v50 = vsub.f32 %v3378_v36, %v609_v49 }
 0x12c   : > { %v611_v51 = vmul.f32 %v610_v50, %v610_v50 }
 0x12e   : > { %v612_v52 = vsel %vm598_vm0, %v611_v51, 0.0 }
 0x12f   : > { %613 = vadd.xlane.f32.xlu0 %v612_v52 }
 0x1a2   : > { %v614_v55 = vpop.xlane.xlu0 %613 }
 0x1a3   : > { %v615_v56 = vmul.f32 %v614_v55, %v3382_v47 }
 0x1a5   : > { %v616_v57 = vadd.f32 1e-12, %v615_v56 }
 0x1a7   : > { %3167 = vrsqrt.f32 %v616_v57  ;;  %vm623_vm3 = vweird.f32 %v616_v57 }
 0x1ad   : > { %v3168_v58 = vpop.eup %3167 }
 0x1ae   : > { %v618_v59 = vmul.f32 %v3168_v58, %v616_v57  ;;  %vm624_vm2 = vweird.f32 %v3168_v58 }
 0x1af   : > { %vm625_vm4 = vmor %vm623_vm3, %vm624_vm2 }
 0x1b0   : > { %v619_v60 = vmul.f32 %v3168_v58, %v618_v59 }
 0x1b2   : > { %v620_v61 = vmul.f32 0.5, %v619_v60 }
 0x1b4   : > { %v621_v62 = vsub.f32 1.5, %v620_v61 }
 0x1b6   : > { %v622_v0 = vmul.f32 %v3168_v58, %v621_v62 }
 0x1b8   : > { %v626_v2 = vsel %vm625_vm4, %v3168_v58, %v622_v0 }
 0x1b9   : > { %v627_v3 = vmul.f32 %v626_v2, %v610_v50 }
 0x1bb   : > { %v629_v5 = vmul.f32 %v628_v1, %v627_v3 }
 0x1bd   : > { %v631_v6 = vadd.f32 %v630_v4, %v629_v5 }
 0x1bf   : > { %v632_v7 = vpack.c.bf16 %v631_v6, %v631_v6 }
 0x1c1   : > { %2855 = vmatmul.msk.bf16.vlgmr.msra.gmra.mxu3 %vm598_vm0, %v632_v7 }
 0x244   : > { %v662_v9 = vpop.f32.mrf.mxu3 }
 0x245   : > { %v3403_v10 = vadd.f32 %v662_v9, %v637_v8 }
 0x247   : > { %673 = vrot.lane.b32.xlu2 %v3403_v10, %s3220_s21  ;;  %667 = vrot.lane.b32.xlu1 %v3403_v10, %s3221_s22  ;;  %v679_v24 = vrot.slane %v3403_v10, 4 }
 0x24c   : > { %v664_v11 = vpop.f32.mrf.mxu3 }
 0x24f   : > { %791 = vrot.lane.b32.xlu2 %v3403_v10, %s3222_s23  ;;  %670 = vrot.lane.b32.xlu1 %v3403_v10, %s3223_s24 }
 0x2a1   : > { %v3413_v12 = vpop.permute.xlu2 %673 }
 0x2a2   : > { %797 = vrot.lane.b32.xlu2 %v3413_v12, %s3222_s23  ;;  %v689_v13 = vrot.slane %v3413_v12, 4 }
 0x2b9   : > { %v3418_v16 = vpop.permute.xlu1 %667 }
 0x2ba   : > { %v690_v17 = vsel %vm677_vm5, %v689_v13, %v3418_v16  ;;  %v691_v18 = vrot.slane %v3418_v16, 4  ;;  %793 = vrot.lane.b32.xlu0 %v3418_v16, %s3222_s23 }
 0x2bb   : > { %v696_v25 = vperm.slane %v690_v17, %v3427_v20 }
 0x2bc   : > { %v692_v19 = vsel %vm677_vm5, %v3413_v12, %v691_v18 }
 0x2bd   : > { %v700_v23 = vperm.slane %v692_v19, %v3427_v20  ;;  %v701_v33 = vrot.slane %v696_v25, 4 }
 0x2bf   : > { %v713_v30 = vrot.slane %v700_v23, 4 }
 0x2c1   : > { %v3432_v26 = vpop.permute.xlu1 %670 }
 0x2c2   : > { %v676_v28 = vrot.slane %v3432_v26, 4  ;;  %v680_v29 = vsel %vm677_vm5, %v3432_v26, %v679_v24  ;;  %795 = vrot.lane.b32.xlu1 %v3432_v26, %s3222_s23 }
 0x2c3   : > { %v688_v31 = vperm.slane %v680_v29, %v3427_v20 }
 0x2c4   : > { %v678_v32 = vsel %vm677_vm5, %v676_v28, %v3403_v10  ;;  %v792_v28 = vpop.permute.xlu2 %791 }
 0x2c5   : > { %v684_v34 = vperm.slane %v678_v32, %v3427_v20  ;;  %v714_v35 = vsel %vm677_vm5, %v713_v30, %v688_v31  ;;  %v715_v37 = vrot.slane %v688_v31, 4 }
 0x2c6   : > { %v720_v38 = vperm.slane %v714_v35, %v3434_v27 }
 0x2c7   : > { %v702_v39 = vsel %vm677_vm5, %v701_v33, %v684_v34  ;;  %v703_v40 = vrot.slane %v684_v34, 4  ;;  %v716_v41 = vsel %vm677_vm5, %v700_v23, %v715_v37  ;;  %v805_v37 = vrot.slane %v792_v28, 4 }
 0x2c8   : > { %v708_v42 = vperm.slane %v702_v39, %v3434_v27  ;;  %v724_v43 = vperm.slane %v716_v41, %v3434_v27  ;;  %v729_v46 = vrot.slane %v720_v38, 4 }
 0x2c9   : > { %v704_v44 = vsel %vm677_vm5, %v696_v25, %v703_v40 }
 0x2ca   : > { %v712_v45 = vperm.slane %v704_v44, %v3434_v27  ;;  %v731_v48 = vrot.slane %v724_v43, 4  ;;  %v725_v49 = vrot.slane %v708_v42, 4  ;;  %v730_v56 = vsel %vm677_vm5, 0.0, %v729_v46 }
 0x2cc   : > { %v727_v50 = vrot.slane %v712_v45, 4  ;;  %v732_v51 = vsel %vm677_vm5, 0.0, %v731_v48  ;;  %v744_v52 = vsel %vm677_vm5, %v731_v48, %v720_v38  ;;  %v726_v62 = vsel %vm677_vm5, 0.0, %v725_v49 }
 0x2cd   : > { %v748_v53 = vperm.slane %v744_v52, %v3427_v20  ;;  %v749_v54 = vrot.slane %v732_v51, 4 }
 0x2ce   : > { %v728_v55 = vsel %vm677_vm5, 0.0, %v727_v50  ;;  %v733_v57 = vsel %vm677_vm5, %v727_v50, %v708_v42 }
 0x2cf   : > { %v738_v58 = vrot.slane %v728_v55, 4  ;;  %v750_v59 = vsel %vm677_vm5, %v749_v54, %v730_v56  ;;  %v737_v60 = vperm.slane %v733_v57, %v3427_v20  ;;  %v769_v61 = vrot.slane %v748_v53, 4 }
 0x2d0   : > { %v754_v0 = vperm.slane %v750_v59, %v3427_v20 }
 0x2d1   : > { %v739_v1 = vsel %vm677_vm5, %v738_v58, %v726_v62  ;;  %v757_v2 = vrot.slane %v737_v60, 4 }
 0x2d2   : > { %v743_v3 = vperm.slane %v739_v1, %v3427_v20  ;;  %v767_v4 = vrot.slane %v754_v0, 4  ;;  %v770_v5 = vsel %vm677_vm5, %v754_v0, %v769_v61 }
 0x2d3   : > { %v778_v6 = vperm.slane %v770_v5, %v3434_v27 }
 0x2d4   : > { %v755_v7 = vrot.slane %v743_v3, 4  ;;  %v768_v8 = vsel %vm677_vm5, %v767_v4, %v748_v53  ;;  %v758_v9 = vsel %vm677_vm5, %v743_v3, %v757_v2 }
 0x2d5   : > { %v774_v11 = vperm.slane %v768_v8, %v3434_v27  ;;  %v766_v13 = vperm.slane %v758_v9, %v3434_v27  ;;  %v783_v14 = vrot.slane %v778_v6, 4 }
 0x2d6   : > { %v756_v15 = vsel %vm677_vm5, %v755_v7, %v737_v60 }
 0x2d7   : > { %v762_v17 = vperm.slane %v756_v15, %v3434_v27  ;;  %v779_v18 = vrot.slane %v774_v11, 4  ;;  %v785_v19 = vrot.slane %v766_v13, 4  ;;  %v3474_v21 = vsel %vm677_vm5, %v783_v14, %v766_v13 }
 0x2d9   : > { %v3477_v22 = vsel %vm677_vm5, %v779_v18, %v762_v17  ;;  %v781_v23 = vrot.slane %v762_v17, 4  ;;  %v3480_v24 = vsel %vm677_vm5, %v778_v6, %v785_v19 }
 0x2db   : > { %v3483_v25 = vsel %vm677_vm5, %v774_v11, %v781_v23 }
 0x2fc   : > { %v798_v29 = vpop.permute.xlu2 %797 }
 0x2fd   : > { %v815_v32 = vrot.slane %v798_v29, 4 }
 0x32c   : > { %v794_v30 = vpop.permute.xlu0 %793 }
 0x32d   : > { %v817_v31 = vrot.slane %v794_v30, 4  ;;  %v816_v34 = vsel %vm677_vm5, %v815_v32, %v794_v30 }
 0x32e   : > { %v822_v38 = vperm.slane %v816_v34, %v3427_v20 }
 0x32f   : > { %v818_v33 = vsel %vm677_vm5, %v798_v29, %v817_v31 }
 0x330   : > { %v826_v35 = vperm.slane %v818_v33, %v3427_v20  ;;  %v827_v45 = vrot.slane %v822_v38, 4 }
 0x332   : > { %v839_v42 = vrot.slane %v826_v35, 4 }
 0x334   : > { %v796_v39 = vpop.permute.xlu1 %795 }
 0x335   : > { %v803_v40 = vrot.slane %v796_v39, 4  ;;  %v806_v41 = vsel %vm677_vm5, %v796_v39, %v805_v37 }
 0x336   : > { %v814_v43 = vperm.slane %v806_v41, %v3427_v20 }
 0x337   : > { %v804_v44 = vsel %vm677_vm5, %v803_v40, %v792_v28 }
 0x338   : > { %v810_v46 = vperm.slane %v804_v44, %v3427_v20  ;;  %v840_v48 = vsel %vm677_vm5, %v839_v42, %v814_v43  ;;  %v841_v49 = vrot.slane %v814_v43, 4  ;;  %v787_v43 = vmul.f32 0.35355338, %v3477_v22 }
 0x339   : > { %v846_v50 = vperm.slane %v840_v48, %v3434_v27  ;;  %v790_v44 = vmul.f32 0.35355338, %v3480_v24  ;;  %v789_v48 = vmul.f32 0.35355338, %v3474_v21  ;;  %v3148_v21 = vpack.i.bf16 %v3413_v12, %v3432_v26 }
 0x33a   : > { %v828_v51 = vsel %vm677_vm5, %v827_v45, %v810_v46  ;;  %v829_v52 = vrot.slane %v810_v46, 4  ;;  %v842_v53 = vsel %vm677_vm5, %v826_v35, %v841_v49  ;;  %v788_v46 = vmul.f32 0.35355338, %v3483_v25 }
 0x33b   : > { %v834_v54 = vperm.slane %v828_v51, %v3434_v27  ;;  %v850_v55 = vperm.slane %v842_v53, %v3434_v27  ;;  %v855_v58 = vrot.slane %v846_v50, 4 }
 0x33c   : > { %v830_v56 = vsel %vm677_vm5, %v822_v38, %v829_v52 }
 0x33d   : > { %v838_v57 = vperm.slane %v830_v56, %v3434_v27  ;;  %v857_v59 = vrot.slane %v850_v55, 4  ;;  %v851_v60 = vrot.slane %v834_v54, 4  ;;  %v856_v4 = vsel %vm677_vm5, 0.0, %v855_v58 }
 0x33f   : > { %v853_v61 = vrot.slane %v838_v57, 4  ;;  %v858_v62 = vsel %vm677_vm5, 0.0, %v857_v59  ;;  %v870_v0 = vsel %vm677_vm5, %v857_v59, %v846_v50  ;;  %v852_v11 = vsel %vm677_vm5, 0.0, %v851_v60 }
 0x340   : > { %v875_v1 = vrot.slane %v858_v62, 4  ;;  %v874_v2 = vperm.slane %v870_v0, %v3427_v20 }
 0x341   : > { %v854_v3 = vsel %vm677_vm5, 0.0, %v853_v61  ;;  %v859_v5 = vsel %vm677_vm5, %v853_v61, %v834_v54  ;;  %v3143_v54 = vpack.i.bf16 %v3418_v16, %v3403_v10 }
 0x342   : > { %v864_v6 = vrot.slane %v854_v3, 4  ;;  %v876_v7 = vsel %vm677_vm5, %v875_v1, %v856_v4  ;;  %v863_v8 = vperm.slane %v859_v5, %v3427_v20  ;;  %v895_v9 = vrot.slane %v874_v2, 4 }
 0x343   : > { %v880_v13 = vperm.slane %v876_v7, %v3427_v20 }
 0x344   : > { %v865_v14 = vsel %vm677_vm5, %v864_v6, %v852_v11  ;;  %v883_v15 = vrot.slane %v863_v8, 4 }
 0x345   : > { %v869_v17 = vperm.slane %v865_v14, %v3427_v20  ;;  %v893_v18 = vrot.slane %v880_v13, 4  ;;  %v896_v19 = vsel %vm677_vm5, %v880_v13, %v895_v9 }
 0x346   : > { %v904_v32 = vperm.slane %v896_v19, %v3434_v27 }
 0x347   : > { %v881_v23 = vrot.slane %v869_v17, 4  ;;  %v894_v28 = vsel %vm677_vm5, %v893_v18, %v874_v2  ;;  %v884_v29 = vsel %vm677_vm5, %v869_v17, %v883_v15 }
 0x348   : > { %v900_v30 = vperm.slane %v894_v28, %v3434_v27  ;;  %v892_v31 = vperm.slane %v884_v29, %v3434_v27  ;;  %v909_v40 = vrot.slane %v904_v32, 4 }
 0x349   : > { %v882_v33 = vsel %vm677_vm5, %v881_v23, %v863_v8 }
 0x34a   : > { %v888_v34 = vperm.slane %v882_v33, %v3434_v27  ;;  %v905_v35 = vrot.slane %v900_v30, 4  ;;  %v911_v37 = vrot.slane %v892_v31, 4  ;;  %v910_v45 = vsel %vm677_vm5, %v909_v40, %v892_v31 }
 0x34c   : > { %v906_v38 = vsel %vm677_vm5, %v905_v35, %v888_v34  ;;  %v907_v39 = vrot.slane %v888_v34, 4  ;;  %v912_v41 = vsel %vm677_vm5, %v904_v32, %v911_v37 }
 0x34d   : > { %2856 = vmatpush.xpose.msk.msrb.mxu3 %vm1035_vm6, %v906_v38  ;;  %2862 = vmatpush.xpose.msk.msrb.mxu2 %vm1035_vm6, %v912_v41 }
 0x34e   : > { %v908_v42 = vsel %vm677_vm5, %v900_v30, %v907_v39 }
 0x350   : > { %2857 = vmatmul.msk.f32.vlgmr.msrb.gmra.mxu3 %vm1035_vm6, %v787_v43  ;;  %2863 = vmatmul.msk.f32.vlgmr.msrb.gmra.mxu2 %vm1035_vm6, %v790_v44 }
 0x351   : > { %2858 = vmatpush.xpose.msk.msra.mxu3 %vm1035_vm6, %v908_v42 }
 0x355   : > { %2860 = vmatpush.xpose.msk.msrb.mxu3 %vm1035_vm6, %v910_v45 }
 0x358   : > { %2859 = vmatmul.msk.f32.vlgmr.msra.gmra.mxu3 %vm1035_vm6, %v788_v46 }
 0x360   : > { %2861 = vmatmul.msk.f32.vlgmr.msrb.gmra.mxu3 %vm1035_vm6, %v789_v48 }
 0x3d3   : > { %v1059_v22 = vpop.f32.mrf.mxu3  ;;  %v1137_v24 = vpop.f32.mrf.mxu2 }
 0x3d4   : > { %v1149_v49 = vsel %vm1035_vm6, %v1137_v24, -inf  ;;  %v1140_v50 = vsel %vm1035_vm6, %v1059_v22, -inf }
 0x3d5   : > { %1150 = vmax.xlane.f32.xlu2 %v1149_v49  ;;  %1141 = vmax.xlane.f32.xlu0 %v1140_v50 }
 0x3db   : > { %v1085_v51 = vpop.f32.mrf.mxu3 }
 0x3dc   : > { %v1143_v52 = vsel %vm1035_vm6, %v1085_v51, -inf }
 0x3dd   : > { %1144 = vmax.xlane.f32.xlu2 %v1143_v52 }
 0x3e3   : > { %v1111_v53 = vpop.f32.mrf.mxu3 }
 0x3e4   : > { %v1146_v25 = vsel %vm1035_vm6, %v1111_v53, -inf }
 0x3e5   : > { %1147 = vmax.xlane.f32.xlu1 %v1146_v25 }
 0x3f5   : > { %3149 = vrot.lane.b32.xlu2 %v3148_v21, %s3226_s25 }
 0x3fe   : > { %3144 = vrot.lane.b32.xlu1 %v3143_v54, %s3226_s25 }
 0x448   : > { %v1151_v55 = vpop.xlane.xlu2 %1150  ;;  %v1142_v56 = vpop.xlane.xlu0 %1141 }
 0x449   : > { %v1152_v57 = vsub.f32 %v1059_v22, %v1142_v56  ;;  %v1155_v16 = vsub.f32 %v1137_v24, %v1151_v55 }
 0x44b   : > { %v1156_v58 = vmul.f32 1.442695, %v1152_v57  ;;  %v1162_v3 = vmul.f32 1.442695, %v1155_v16 }
 0x44d   : > { %3169 = vpow2.f32 %v1156_v58 }
 0x450   : > { %v1145_v59 = vpop.xlane.xlu2 %1144 }
 0x451   : > { %v1153_v60 = vsub.f32 %v1085_v51, %v1145_v59 }
 0x453   : > { %v1158_v61 = vmul.f32 1.442695, %v1153_v60  ;;  %v3547_v62 = vpop.eup %3169 }
 0x454   : > { %v1164_v12 = vsel %vm1035_vm6, %v3547_v62, 0.0 }
 0x455   : > { %3171 = vpow2.f32 %v1158_v61  ;;  %1165 = vadd.xlane.f32.xlu1 %v1164_v12 }
 0x458   : > { %v1148_v26 = vpop.xlane.xlu1 %1147  ;;  %v3150_v7 = vpop.permute.xlu2 %3149 }
 0x459   : > { %v1154_v0 = vsub.f32 %v1111_v53, %v1148_v26  ;;  %v3152_v9 = vunpack.i.h.bf16 %v3150_v7  ;;  %v3151_v11 = vunpack.i.l.bf16 %v3150_v7 }
 0x45b   : > { %v3551_v10 = vpop.eup %3171  ;;  %v1160_v1 = vmul.f32 1.442695, %v1154_v0  ;;  %v937_v14 = vrot.slane %v3152_v9, 4  ;;  %v925_v15 = vrot.slane %v3151_v11, 4 }
 0x45c   : > { %v1167_v2 = vsel %vm1035_vm6, %v3551_v10, 0.0 }
 0x45d   : > { %3173 = vpow2.f32 %v1160_v1  ;;  %1168 = vadd.xlane.f32.xlu0 %v1167_v2 }
 0x45e   : > { %3175 = vpow2.f32 %v1162_v3 }
 0x463   : > { %v3555_v4 = vpop.eup %3173 }
 0x464   : > { %v1170_v5 = vsel %vm1035_vm6, %v3555_v4, 0.0  ;;  %v3559_v6 = vpop.eup %3175 }
 0x465   : > { %1171 = vadd.xlane.f32.xlu0 %v1170_v5  ;;  %v1173_v8 = vsel %vm1035_vm6, %v3559_v6, 0.0 }
 0x46d   : > { %1174 = vadd.xlane.f32.xlu0 %v1173_v8 }
 0x470   : > { %v3145_v13 = vpop.permute.xlu1 %3144 }
 0x471   : > { %v3147_v17 = vunpack.i.h.bf16 %v3145_v13  ;;  %v3146_v18 = vunpack.i.l.bf16 %v3145_v13 }
 0x473   : > { %v938_v19 = vsel %vm677_vm5, %v937_v14, %v3147_v17  ;;  %v939_v23 = vrot.slane %v3147_v17, 4  ;;  %v926_v28 = vsel %vm677_vm5, %v925_v15, %v3146_v18  ;;  %v927_v29 = vrot.slane %v3146_v18, 4 }
 0x474   : > { %v944_v30 = vperm.slane %v938_v19, %v3427_v20  ;;  %v932_v31 = vperm.slane %v926_v28, %v3427_v20 }
 0x475   : > { %v940_v32 = vsel %vm677_vm5, %v3152_v9, %v939_v23  ;;  %v928_v33 = vsel %vm677_vm5, %v3151_v11, %v927_v29 }
 0x476   : > { %v948_v34 = vperm.slane %v940_v32, %v3427_v20  ;;  %v949_v35 = vrot.slane %v944_v30, 4  ;;  %v936_v37 = vperm.slane %v928_v33, %v3427_v20  ;;  %v951_v38 = vrot.slane %v932_v31, 4 }
 0x478   : > { %v961_v39 = vrot.slane %v948_v34, 4  ;;  %v950_v40 = vsel %vm677_vm5, %v949_v35, %v932_v31  ;;  %v952_v41 = vsel %vm677_vm5, %v944_v30, %v951_v38  ;;  %v963_v42 = vrot.slane %v936_v37, 4 }
 0x479   : > { %v956_v43 = vperm.slane %v950_v40, %v3434_v27  ;;  %v960_v44 = vperm.slane %v952_v41, %v3434_v27 }
 0x47a   : > { %v962_v45 = vsel %vm677_vm5, %v961_v39, %v936_v37  ;;  %v964_v46 = vsel %vm677_vm5, %v948_v34, %v963_v42 }
 0x47b   : > { %v968_v48 = vperm.slane %v962_v45, %v3434_v27  ;;  %v972_v22 = vperm.slane %v964_v46, %v3434_v27  ;;  %v973_v24 = vrot.slane %v956_v43, 4  ;;  %v975_v49 = vrot.slane %v960_v44, 4 }
 0x47d   : > { %v976_v50 = vsel %vm677_vm5, 0.0, %v975_v49  ;;  %v979_v51 = vrot.slane %v972_v22, 4  ;;  %v977_v52 = vrot.slane %v968_v48, 4  ;;  %v981_v25 = vsel %vm677_vm5, %v975_v49, %v956_v43 }
 0x47e   : > { %v986_v53 = vrot.slane %v976_v50, 4  ;;  %v974_v21 = vsel %vm677_vm5, 0.0, %v973_v24  ;;  %v985_v55 = vperm.slane %v981_v25, %v3427_v20 }
 0x47f   : > { %v980_v54 = vsel %vm677_vm5, 0.0, %v979_v51  ;;  %v992_v56 = vsel %vm677_vm5, %v979_v51, %v968_v48  ;;  %v978_v60 = vsel %vm677_vm5, 0.0, %v977_v52 }
 0x480   : > { %v987_v57 = vsel %vm677_vm5, %v986_v53, %v974_v21  ;;  %v996_v58 = vperm.slane %v992_v56, %v3427_v20  ;;  %v997_v59 = vrot.slane %v980_v54, 4  ;;  %v1005_v12 = vrot.slane %v985_v55, 4 }
 0x481   : > { %v991_v61 = vperm.slane %v987_v57, %v3427_v20 }
 0x482   : > { %v998_v26 = vsel %vm677_vm5, %v997_v59, %v978_v60  ;;  %v1017_v0 = vrot.slane %v996_v58, 4 }
 0x483   : > { %v1002_v16 = vperm.slane %v998_v26, %v3427_v20  ;;  %v1003_v1 = vrot.slane %v991_v61, 4  ;;  %v1006_v2 = vsel %vm677_vm5, %v991_v61, %v1005_v12 }
 0x484   : > { %v1014_v3 = vperm.slane %v1006_v2, %v3434_v27 }
 0x485   : > { %v1015_v5 = vrot.slane %v1002_v16, 4  ;;  %v1018_v7 = vsel %vm677_vm5, %v1002_v16, %v1017_v0  ;;  %v1004_v8 = vsel %vm677_vm5, %v1003_v1, %v985_v55 }
 0x486   : > { %v1026_v9 = vperm.slane %v1018_v7, %v3434_v27  ;;  %v1033_v11 = vrot.slane %v1014_v3, 4  ;;  %v1010_v13 = vperm.slane %v1004_v8, %v3434_v27 }
 0x487   : > { %v1016_v14 = vsel %vm677_vm5, %v1015_v5, %v996_v58 }
 0x488   : > { %v1031_v15 = vrot.slane %v1026_v9, 4  ;;  %v1034_v17 = vsel %vm677_vm5, %v1026_v9, %v1033_v11  ;;  %v1022_v18 = vperm.slane %v1016_v14, %v3434_v27  ;;  %v1029_v19 = vrot.slane %v1010_v13, 4 }
 0x489   : > { %1271 = vmatpush.msrb.mxu0 %v1034_v17 }
 0x48a   : > { %v1030_v23 = vsel %vm677_vm5, %v1022_v18, %v1029_v19  ;;  %v1032_v28 = vsel %vm677_vm5, %v1031_v15, %v1014_v3  ;;  %v1027_v29 = vrot.slane %v1022_v18, 4 }
 0x48b   : > { %1225 = vmatpush.msra.mxu2 %v1030_v23  ;;  %1248 = vmatpush.msra.mxu3 %v1032_v28 }
 0x48c   : > { %v1028_v30 = vsel %vm677_vm5, %v1027_v29, %v1010_v13 }
 0x48d   : > { %1202 = vmatpush.msrb.mxu1 %v1028_v30 }
 0x4c8   : > { %v1166_v31 = vpop.xlane.xlu1 %1165 }
 0x4c9   : > { %3177 = vrcp.f32 %v1166_v31 }
 0x4cf   : > { %v3178_v32 = vpop.eup %3177 }
 0x4d0   : > { %v1169_v33 = vpop.xlane.xlu0 %1168  ;;  %v1180_v34 = vmul.f32 %v3178_v32, %v3547_v62 }
 0x4d1   : > { %3179 = vrcp.f32 %v1169_v33 }
 0x4d2   : > { %2864 = vmatmul.msk.f32.vlgmr.msrb.gmra.mxu1 %vm1035_vm6, %v1180_v34 }
 0x4d7   : > { %v3180_v35 = vpop.eup %3179 }
 0x4d8   : > { %v1181_v37 = vmul.f32 %v3180_v35, %v3551_v10  ;;  %v1172_v38 = vpop.xlane.xlu0 %1171 }
 0x4d9   : > { %3181 = vrcp.f32 %v1172_v38 }
 0x4da   : > { %2865 = vmatmul.msk.f32.vlgmr.msra.gmra.mxu2 %vm1035_vm6, %v1181_v37 }
 0x4df   : > { %v3182_v39 = vpop.eup %3181 }
 0x4e0   : > { %v1182_v40 = vmul.f32 %v3182_v39, %v3555_v4  ;;  %v1175_v41 = vpop.xlane.xlu0 %1174 }
 0x4e1   : > { %3183 = vrcp.f32 %v1175_v41 }
 0x4e2   : > { %2866 = vmatmul.msk.f32.vlgmr.msra.gmra.mxu3 %vm1035_vm6, %v1182_v40 }
 0x4e7   : > { %v3184_v42 = vpop.eup %3183 }
 0x4e8   : > { %v1183_v43 = vmul.f32 %v3184_v42, %v3559_v6 }
 0x4ea   : > { %2867 = vmatmul.msk.f32.vlgmr.msrb.gmra.mxu0 %vm1035_vm6, %v1183_v43 }
 0x54f   : > { %v1204_v62 = vpop.f32.mrf.mxu1 }
 0x550   : > { %v1278_v45 = vrot.slane %v1204_v62, 4 }
 0x55d   : > { %v1227_v44 = vpop.f32.mrf.mxu2 }
 0x55e   : > { %v1290_v46 = vrot.slane %v1227_v44, 4 }
 0x565   : > { %v1250_v10 = vpop.f32.mrf.mxu3 }
 0x566   : > { %v1276_v48 = vrot.slane %v1250_v10, 4  ;;  %v1279_v22 = vsel %vm677_vm5, %v1250_v10, %v1278_v45 }
 0x567   : > { %v1287_v24 = vperm.slane %v1279_v22, %v3427_v20  ;;  %v1273_v4 = vpop.f32.mrf.mxu0 }
 0x568   : > { %v1277_v49 = vsel %vm677_vm5, %v1276_v48, %v1204_v62  ;;  %v1288_v50 = vrot.slane %v1273_v4, 4  ;;  %v1291_v51 = vsel %vm677_vm5, %v1273_v4, %v1290_v46  ;;  %v3087_v4 = vld [vmem:[%s4072_s4] sm:$0xff] }
 0x569   : > { %v1283_v6 = vperm.slane %v1277_v49, %v3427_v20  ;;  %v1314_v52 = vrot.slane %v1287_v24, 4  ;;  %v1299_v53 = vperm.slane %v1291_v51, %v3427_v20 }
 0x56a   : > { %v1289_v25 = vsel %vm677_vm5, %v1288_v50, %v1227_v44 }
 0x56b   : > { %v1302_v21 = vrot.slane %v1283_v6, 4  ;;  %v1295_v54 = vperm.slane %v1289_v25, %v3427_v20  ;;  %v1312_v55 = vrot.slane %v1299_v53, 4  ;;  %v1315_v56 = vsel %vm677_vm5, %v1299_v53, %v1314_v52 }
 0x56c   : > { %v1323_v57 = vperm.slane %v1315_v56, %v3434_v27 }
 0x56d   : > { %v1300_v58 = vrot.slane %v1295_v54, 4  ;;  %v1303_v59 = vsel %vm677_vm5, %v1295_v54, %v1302_v21  ;;  %v1313_v60 = vsel %vm677_vm5, %v1312_v55, %v1287_v24  ;;  %v3088_v24 = vld [vmem:[%s4072_s4 + $0x8] sm:$0xff]  ;;  %v1437_v21 = vperm.slane %v3397_v63, 3 }
 0x56e   : > { %v1311_v61 = vperm.slane %v1303_v59, %v3434_v27  ;;  %v1319_v12 = vperm.slane %v1313_v60, %v3434_v27  ;;  %v1330_v26 = vrot.slane %v1323_v57, 4  ;;  %1429 = vmatpush.bf16.msra.mxu1 %v3088_v24  ;;  %v1587_v24 = vperm.slane %v3397_v63, 7 }
 0x56f   : > { %v1301_v0 = vsel %vm677_vm5, %v1300_v58, %v1283_v6 }
 0x570   : > { %v1307_v16 = vperm.slane %v1301_v0, %v3434_v27  ;;  %v1326_v1 = vrot.slane %v1311_v61, 4  ;;  %v1328_v2 = vrot.slane %v1319_v12, 4  ;;  %v1331_v3 = vsel %vm677_vm5, 0.0, %v1330_v26  ;;  %v3089_v0 = vld [vmem:[%s4073_s5] sm:$0xff] }
 0x571   : > { %v1343_v5 = vsel %vm677_vm5, %v1330_v26, %v1319_v12  ;;  %v1348_v7 = vrot.slane %v1331_v3, 4 }
 0x572   : > { %v1324_v8 = vrot.slane %v1307_v16, 4  ;;  %v1327_v9 = vsel %vm677_vm5, 0.0, %v1326_v1  ;;  %v1329_v11 = vsel %vm677_vm5, 0.0, %v1328_v2  ;;  %v1347_v13 = vperm.slane %v1343_v5, %v3427_v20  ;;  %1430 = vmatpush.bf16.msra.mxu1 %v3087_v4 }
 0x573   : > { %v1337_v14 = vrot.slane %v1327_v9, 4  ;;  %v1332_v15 = vsel %vm677_vm5, %v1326_v1, %v1307_v16  ;;  %v1349_v17 = vsel %vm677_vm5, %v1348_v7, %v1329_v11  ;;  %v3098_v16 = vld [vmem:[%s4074_s6 + $0x38] sm:$0xff] }
 0x574   : > { %v1325_v18 = vsel %vm677_vm5, 0.0, %v1324_v8  ;;  %v1336_v19 = vperm.slane %v1332_v15, %v3427_v20  ;;  %v1353_v23 = vperm.slane %v1349_v17, %v3427_v20  ;;  %v1368_v28 = vrot.slane %v1347_v13, 4  ;;  %1573 = vmatpush.bf16.msrb.mxu3 %v3098_v16 }
 0x575   : > { %v1338_v29 = vsel %vm677_vm5, %v1337_v14, %v1325_v18  ;;  %v1461_v14 = vperm.slane %v3397_v63, 4  ;;  %v1463_v18 = vperm.slane %v3397_v63, 5 }
 0x576   : > { %v1342_v30 = vperm.slane %v1338_v29, %v3427_v20  ;;  %v1356_v31 = vrot.slane %v1336_v19, 4  ;;  %v1369_v32 = vsel %vm677_vm5, %v1353_v23, %v1368_v28  ;;  %v1366_v33 = vrot.slane %v1353_v23, 4  ;;  %v3097_v29 = vld [vmem:[%s4074_s6 + $0x30] sm:$0xff] }
 0x577   : > { %v1377_v34 = vperm.slane %v1369_v32, %v3434_v27  ;;  %v3094_v32 = vld [vmem:[%s4074_s6 + $0x18] sm:$0xff] }
 0x578   : > { %v1357_v35 = vsel %vm677_vm5, %v1342_v30, %v1356_v31  ;;  %v1354_v37 = vrot.slane %v1342_v30, 4  ;;  %v1367_v38 = vsel %vm677_vm5, %v1366_v33, %v1347_v13  ;;  %1574 = vmatpush.bf16.msrb.mxu3 %v3097_v29  ;;  %v3096_v30 = vld [vmem:[%s4074_s6 + $0x28] sm:$0xff]  ;;  %v3095_v31 = vld [vmem:[%s4074_s6 + $0x20] sm:$0xff]  ;;  %v3093_v33 = vld [vmem:[%s4074_s6 + $0x10] sm:$0xff] }
 0x579   : > { %v1365_v39 = vperm.slane %v1357_v35, %v3434_v27  ;;  %v1382_v40 = vrot.slane %v1377_v34, 4  ;;  %v1373_v41 = vperm.slane %v1367_v38, %v3434_v27  ;;  %v3091_v35 = vld [vmem:[%s4074_s6] sm:$0xff] }
 0x57a   : > { %v1355_v42 = vsel %vm677_vm5, %v1354_v37, %v1336_v19  ;;  %v1470_v37 = vperm.slane %v3397_v63, 6  ;;  %v3100_v63 = vld [vmem:[%s4071_s3 + $0x18] sm:$0xff] }
 0x57b   : > { %v1383_v43 = vsel %vm677_vm5, %v1382_v40, %v1365_v39  ;;  %v1361_v62 = vperm.slane %v1355_v42, %v3434_v27  ;;  %v1378_v44 = vrot.slane %v1373_v41, 4  ;;  %v1384_v48 = vrot.slane %v1365_v39, 4  ;;  %1645 = vmatpush.bf16.msrb.mxu1 %v3100_v63 }
 0x57c   : > { %1391 = vrot.lane.b32.xlu0 %v1383_v43, %s3227_s26  ;;  %1575 = vmatpush.bf16.msrb.mxu3 %v3096_v30 }
 0x57d   : > { %v1380_v45 = vrot.slane %v1361_v62, 4  ;;  %v1379_v10 = vsel %vm677_vm5, %v1378_v44, %v1361_v62  ;;  %v1385_v22 = vsel %vm677_vm5, %v1377_v34, %v1384_v48  ;;  %v3092_v34 = vld [vmem:[%s4074_s6 + $0x8] sm:$0xff] }
 0x57f   : > { %v1381_v46 = vsel %vm677_vm5, %v1373_v41, %v1380_v45 }
 0x580   : > { %1387 = vrot.lane.b32.xlu2 %v1381_v46, %s3228_s27  ;;  %1576 = vmatpush.bf16.msrb.mxu3 %v3095_v31 }
 0x584   : > { %1577 = vmatpush.bf16.msrb.mxu3 %v3094_v32 }
 0x588   : > { %1395 = vrot.lane.b32.xlu2 %v1385_v22, %s3229_s28  ;;  %1578 = vmatpush.bf16.msrb.mxu3 %v3093_v33 }
 0x58c   : > { %1579 = vmatpush.bf16.msrb.mxu3 %v3092_v34 }
 0x590   : > { %1580 = vmatpush.bf16.msrb.mxu3 %v3091_v35 }
 0x5da   : > { %v1388_v49 = vpop.permute.xlu2 %1387 }
 0x5db   : > { %v1398_v50 = vsel %vm1035_vm6, %v1379_v10, %v1388_v49 }
 0x5e2   : > { %v1396_v6 = vpop.permute.xlu2 %1395 }
 0x5ee   : > { %v1392_v51 = vpop.permute.xlu0 %1391 }
 0x5ef   : > { %v1400_v52 = vsel %vm1399_vm7, %v1398_v50, %v1392_v51 }
 0x5f0   : > { %v1402_v53 = vsel %vm1401_vm8, %v1400_v52, %v1396_v6 }
 0x5f1   : > { %v1403_v25 = vpack.c.bf16 %v1402_v53, %v1402_v53 }
 0x5f3   : > { %2876 = vmatmul.msk.bf16.vlgmr.msra.gmra.mxu1 %vm598_vm0, %v1403_v25 }
 0x670   : > { %v1432_v54 = vpop.f32.mrf.mxu1 }
 0x671   : > { %v1436_v55 = vadd.f32 %v1432_v54, %v3378_v36  ;;  %v3090_v36 = vld [vmem:[%s4073_s5 + $0x8] sm:$0xff] }
 0x672   : > { %1492 = vmatpush.bf16.msrb.mxu2 %v3090_v36 }
 0x673   : > { %v3666_v56 = vadd.f32 %v1437_v21, %v1436_v55  ;;  %v3099_v55 = vld [vmem:[%s4071_s3 + $0x10] sm:$0xff] }
 0x674   : > { %1646 = vmatpush.bf16.msrb.mxu1 %v3099_v55 }
 0x675   : > { %v1439_v57 = vsel %vm598_vm0, %v3666_v56, 0.0 }
 0x676   : > { %1440 = vadd.xlane.f32.xlu2 %v1439_v57  ;;  %1493 = vmatpush.bf16.msrb.mxu2 %v3089_v0 }
 0x678   : > { %v1434_v58 = vpop.f32.mrf.mxu1 }
 0x6e9   : > { %v1441_v59 = vpop.xlane.xlu2 %1440 }
 0x6ea   : > { %v1442_v60 = vmul.f32 %v1441_v59, %v3382_v47 }
 0x6ec   : > { %v1443_v61 = vsub.f32 %v3666_v56, %v1442_v60 }
 0x6ee   : > { %v1444_v12 = vmul.f32 %v1443_v61, %v1443_v61 }
 0x6f0   : > { %v1445_v26 = vsel %vm598_vm0, %v1444_v12, 0.0 }
 0x6f1   : > { %1446 = vadd.xlane.f32.xlu0 %v1445_v26  ;;  %v3727_v26 = vld [vmem:[%s4075_s7 + $0x8] sm:$0xff] }
 0x6f2   : > { %v1613_v16 = vperm.slane %v3727_v26, 0 }
 0x764   : > { %v1447_v1 = vpop.xlane.xlu0 %1446 }
 0x765   : > { %v1448_v2 = vmul.f32 %v1447_v1, %v3382_v47 }
 0x767   : > { %v1449_v3 = vadd.f32 1e-12, %v1448_v2 }
 0x769   : > { %3185 = vrsqrt.f32 %v1449_v3  ;;  %vm1456_vm10 = vweird.f32 %v1449_v3 }
 0x76f   : > { %v3186_v5 = vpop.eup %3185 }
 0x770   : > { %v1451_v7 = vmul.f32 %v3186_v5, %v1449_v3  ;;  %vm1457_vm9 = vweird.f32 %v3186_v5  ;;  %v1615_v3 = vperm.slane %v3727_v26, 1 }
 0x771   : > { %vm1458_vm11 = vmor %vm1456_vm10, %vm1457_vm9 }
 0x772   : > { %v1452_v8 = vmul.f32 %v3186_v5, %v1451_v7 }
 0x774   : > { %v1453_v9 = vmul.f32 0.5, %v1452_v8 }
 0x776   : > { %v1454_v11 = vsub.f32 1.5, %v1453_v9  ;;  %v1623_v9 = vperm.slane %v3727_v26, 2 }
 0x778   : > { %v1455_v13 = vmul.f32 %v3186_v5, %v1454_v11 }
 0x77a   : > { %v1459_v15 = vsel %vm1458_vm11, %v3186_v5, %v1455_v13 }
 0x77b   : > { %v1460_v17 = vmul.f32 %v1459_v15, %v1443_v61 }
 0x77d   : > { %v1462_v19 = vmul.f32 %v1461_v14, %v1460_v17 }
 0x77f   : > { %v1464_v23 = vadd.f32 %v1463_v18, %v1462_v19 }
 0x781   : > { %v1465_v28 = vpack.c.bf16 %v1464_v23, %v1464_v23 }
 0x783   : > { %2885 = vmatmul.msk.bf16.vlgmr.msrb.gmra.mxu2 %vm598_vm0, %v1465_v28 }
 0x806   : > { %v1495_v38 = vpop.f32.mrf.mxu2 }
 0x807   : > { %v1496_v39 = vadd.f32 %v1495_v38, %v1470_v37 }
 0x809   : > { %v1499_v40 = vmul.f32 %v1496_v39, %v1496_v39 }
 0x80b   : > { %v1500_v41 = vmul.f32 %v1499_v40, %v1496_v39 }
 0x80d   : > { %v1501_v42 = vmul.f32 0.044715, %v1500_v41 }
 0x80e   : > { %v1497_v43 = vpop.f32.mrf.mxu2 }
 0x80f   : > { %v1502_v62 = vadd.f32 %v1501_v42, %v1496_v39 }
 0x811   : > { %v1503_v44 = vmul.f32 0.7978846, %v1502_v62 }
 0x813   : > { %3187 = vtanh.f32 %v1503_v44 }
 0x819   : > { %v3188_v45 = vpop.eup %3187 }
 0x81a   : > { %v1505_v10 = vadd.f32 1.0, %v3188_v45 }
 0x81c   : > { %v1506_v46 = vmul.f32 0.5, %v1505_v10 }
 0x81e   : > { %v1507_v48 = vmul.f32 %v1506_v46, %v1496_v39 }
 0x820   : > { %v1508_v22 = vpack.c.bf16 %v1507_v48, %v1507_v48 }
 0x822   : > { %1581 = vmatmul.bf16.vlgmr.msrb.gmra.mxu3 %v1508_v22 }
 0x8a5   : > { %v1582_v4 = vpop.f32.mrf.mxu3 }
 0x8a6   : > { %v1586_v49 = vadd.f32 %v1582_v4, %v3666_v56 }
 0x8a8   : > { %v3710_v50 = vadd.f32 %v1587_v24, %v1586_v49 }
 0x8aa   : > { %v1591_v51 = vsel %vm598_vm0, %v3710_v50, 0.0 }
 0x8ab   : > { %1592 = vadd.xlane.f32.xlu1 %v1591_v51 }
 0x8ad   : > { %v1584_v6 = vpop.f32.mrf.mxu3 }
 0x91e   : > { %v1593_v52 = vpop.xlane.xlu1 %1592 }
 0x91f   : > { %v1594_v53 = vmul.f32 %v1593_v52, %v3382_v47 }
 0x921   : > { %v1595_v25 = vsub.f32 %v3710_v50, %v1594_v53 }
 0x923   : > { %v1596_v21 = vmul.f32 %v1595_v25, %v1595_v25 }
 0x925   : > { %v1597_v54 = vsel %vm598_vm0, %v1596_v21, 0.0 }
 0x926   : > { %1598 = vadd.xlane.f32.xlu1 %v1597_v54 }
 0x999   : > { %v1599_v56 = vpop.xlane.xlu1 %1598 }
 0x99a   : > { %v1600_v57 = vmul.f32 %v1599_v56, %v3382_v47 }
 0x99c   : > { %v1601_v58 = vadd.f32 1e-12, %v1600_v57 }
 0x99e   : > { %3189 = vrsqrt.f32 %v1601_v58  ;;  %vm1608_vm13 = vweird.f32 %v1601_v58 }
 0x9a4   : > { %v3190_v59 = vpop.eup %3189 }
 0x9a5   : > { %v1603_v60 = vmul.f32 %v3190_v59, %v1601_v58  ;;  %vm1609_vm12 = vweird.f32 %v3190_v59 }
 0x9a6   : > { %vm1610_vm14 = vmor %vm1608_vm13, %vm1609_vm12 }
 0x9a7   : > { %v1604_v61 = vmul.f32 %v3190_v59, %v1603_v60 }
 0x9a9   : > { %v1605_v12 = vmul.f32 0.5, %v1604_v61 }
 0x9ab   : > { %v1606_v36 = vsub.f32 1.5, %v1605_v12 }
 0x9ad   : > { %v1607_v0 = vmul.f32 %v3190_v59, %v1606_v36 }
 0x9af   : > { %v1611_v1 = vsel %vm1610_vm14, %v3190_v59, %v1607_v0 }
 0x9b0   : > { %v1612_v2 = vmul.f32 %v1611_v1, %v1595_v25 }
 0x9b2   : > { %v1614_v5 = vmul.f32 %v1613_v16, %v1612_v2 }
 0x9b4   : > { %v1616_v7 = vadd.f32 %v1615_v3, %v1614_v5 }
 0x9b6   : > { %v1617_v8 = vpack.c.bf16 %v1616_v7, %v1616_v7 }
 0x9b8   : > { %2931 = vmatmul.msk.bf16.vlgmr.msrb.gmra.mxu1 %vm598_vm0, %v1617_v8 }
 0xa35   : > { %v1648_v11 = vpop.f32.mrf.mxu1 }
 0xa36   : > { %v3733_v13 = vadd.f32 %v1648_v11, %v1623_v9 }
 0xa38   : > { %1659 = vrot.lane.b32.xlu0 %v3733_v13, %s3220_s21  ;;  %1656 = vrot.lane.b32.xlu2 %v3733_v13, %s3223_s24  ;;  %v1664_v19 = vrot.slane %v3733_v13, 4 }
 0xa39   : > { %1653 = vrot.lane.b32.xlu1 %v3733_v13, %s3221_s22 }
 0xa3d   : > { %v1650_v14 = vpop.f32.mrf.mxu1 }
 0xa41   : > { %1776 = vrot.lane.b32.xlu1 %v3733_v13, %s3222_s23 }
 0xa92   : > { %v3743_v15 = vpop.permute.xlu2 %1656 }
 0xa93   : > { %1780 = vrot.lane.b32.xlu1 %v3743_v15, %s3222_s23  ;;  %v1662_v28 = vrot.slane %v3743_v15, 4  ;;  %v1665_v29 = vsel %vm677_vm5, %v3743_v15, %v1664_v19 }
 0xa94   : > { %v1673_v33 = vperm.slane %v1665_v29, %v3427_v20 }
 0xa95   : > { %v1663_v32 = vsel %vm677_vm5, %v1662_v28, %v3733_v13 }
 0xa96   : > { %v1669_v37 = vperm.slane %v1663_v32, %v3427_v20  ;;  %v1700_v38 = vrot.slane %v1673_v33, 4 }
 0xa98   : > { %v1688_v42 = vrot.slane %v1669_v37, 4 }
 0xaaa   : > { %v3747_v17 = vpop.permute.xlu0 %1659 }
 0xaab   : > { %v3749_v18 = vpop.permute.xlu1 %1653  ;;  %1782 = vrot.lane.b32.xlu0 %v3747_v17, %s3222_s23  ;;  %v1674_v30 = vrot.slane %v3747_v17, 4 }
 0xaac   : > { %1778 = vrot.lane.b32.xlu2 %v3749_v18, %s3222_s23  ;;  %v1676_v23 = vrot.slane %v3749_v18, 4 }
 0xaad   : > { %v1675_v34 = vsel %vm677_vm5, %v1674_v30, %v3749_v18 }
 0xaae   : > { %v1677_v31 = vsel %vm677_vm5, %v3747_v17, %v1676_v23  ;;  %v1681_v39 = vperm.slane %v1675_v34, %v3427_v20 }
 0xaaf   : > { %v1685_v35 = vperm.slane %v1677_v31, %v3427_v20 }
 0xab0   : > { %v1686_v43 = vrot.slane %v1681_v39, 4  ;;  %v1689_v62 = vsel %vm677_vm5, %v1681_v39, %v1688_v42 }
 0xab1   : > { %v1698_v40 = vrot.slane %v1685_v35, 4  ;;  %v1701_v41 = vsel %vm677_vm5, %v1685_v35, %v1700_v38  ;;  %v1697_v46 = vperm.slane %v1689_v62, %v3434_v27 }
 0xab2   : > { %v1709_v44 = vperm.slane %v1701_v41, %v3434_v27  ;;  %v1687_v48 = vsel %vm677_vm5, %v1686_v43, %v1669_v37 }
 0xab3   : > { %v1699_v45 = vsel %vm677_vm5, %v1698_v40, %v1673_v33  ;;  %v1777_v10 = vpop.permute.xlu1 %1776  ;;  %v1693_v4 = vperm.slane %v1687_v48, %v3434_v27  ;;  %v1712_v49 = vrot.slane %v1697_v46, 4 }
 0xab4   : > { %v1705_v22 = vperm.slane %v1699_v45, %v3434_v27  ;;  %v1716_v24 = vrot.slane %v1709_v44, 4  ;;  %v1790_v63 = vrot.slane %v1777_v10, 4 }
 0xab5   : > { %v1710_v53 = vrot.slane %v1693_v4, 4  ;;  %v1713_v25 = vsel %vm677_vm5, 0.0, %v1712_v49  ;;  %v1718_v3 = vsel %vm677_vm5, %v1712_v49, %v1693_v4 }
 0xab6   : > { %v1714_v51 = vrot.slane %v1705_v22, 4  ;;  %v1717_v6 = vsel %vm677_vm5, 0.0, %v1716_v24  ;;  %v1729_v56 = vsel %vm677_vm5, %v1716_v24, %v1705_v22  ;;  %v1723_v57 = vrot.slane %v1713_v25, 4 }
 0xab7   : > { %v1734_v21 = vrot.slane %v1717_v6, 4  ;;  %v1711_v59 = vsel %vm677_vm5, 0.0, %v1710_v53  ;;  %v1733_v12 = vperm.slane %v1729_v56, %v3427_v20  ;;  %v1722_v28 = vperm.slane %v1718_v3, %v3427_v20 }
 0xab8   : > { %v1715_v54 = vsel %vm677_vm5, 0.0, %v1714_v51  ;;  %v1724_v16 = vsel %vm677_vm5, %v1723_v57, %v1711_v59 }
 0xab9   : > { %v1735_v60 = vsel %vm677_vm5, %v1734_v21, %v1715_v54  ;;  %v1754_v11 = vrot.slane %v1733_v12, 4  ;;  %v1728_v14 = vperm.slane %v1724_v16, %v3427_v20  ;;  %v1742_v45 = vrot.slane %v1722_v28, 4 }
 0xaba   : > { %v1739_v2 = vperm.slane %v1735_v60, %v3427_v20 }
 0xabb   : > { %v1740_v41 = vrot.slane %v1728_v14, 4  ;;  %v1743_v16 = vsel %vm677_vm5, %v1728_v14, %v1742_v45 }
 0xabc   : > { %v1752_v30 = vrot.slane %v1739_v2, 4  ;;  %v1755_v37 = vsel %vm677_vm5, %v1739_v2, %v1754_v11 }
 0xabd   : > { %v1763_v46 = vperm.slane %v1755_v37, %v3434_v27  ;;  %v1741_v6 = vsel %vm677_vm5, %v1740_v41, %v1722_v28  ;;  %v1751_v28 = vperm.slane %v1743_v16, %v3434_v27 }
 0xabe   : > { %v1753_v44 = vsel %vm677_vm5, %v1752_v30, %v1733_v12 }
 0xabf   : > { %v1768_v3 = vrot.slane %v1763_v46, 4 }
 0xb05   : > { %v1781_v52 = vpop.permute.xlu1 %1780 }
 0xb06   : > { %v1788_v55 = vrot.slane %v1781_v52, 4  ;;  %v1791_v58 = vsel %vm677_vm5, %v1781_v52, %v1790_v63  ;;  %v1779_v61 = vpop.permute.xlu2 %1778  ;;  %v1759_v52 = vperm.slane %v1753_v44, %v3434_v27  ;;  %v1770_v44 = vrot.slane %v1751_v28, 4 }
 0xb07   : > { %v1799_v0 = vperm.slane %v1791_v58, %v3427_v20  ;;  %v1802_v1 = vrot.slane %v1779_v61, 4 }
 0xb08   : > { %v1789_v36 = vsel %vm677_vm5, %v1788_v55, %v1777_v10 }
 0xb09   : > { %v1795_v5 = vperm.slane %v1789_v36, %v3427_v20  ;;  %v1826_v19 = vrot.slane %v1799_v0, 4 }
 0xb0b   : > { %v1814_v31 = vrot.slane %v1795_v5, 4 }
 0xb1d   : > { %v1783_v7 = vpop.permute.xlu0 %1782 }
 0xb1e   : > { %v1800_v8 = vrot.slane %v1783_v7, 4  ;;  %v1803_v9 = vsel %vm677_vm5, %v1783_v7, %v1802_v1  ;;  %v1747_v1 = vperm.slane %v1741_v6, %v3434_v27 }
 0xb1f   : > { %v1811_v23 = vperm.slane %v1803_v9, %v3427_v20 }
 0xb20   : > { %v1801_v29 = vsel %vm677_vm5, %v1800_v8, %v1779_v61  ;;  %v1766_v30 = vrot.slane %v1747_v1, 4 }
 0xb21   : > { %v1807_v32 = vperm.slane %v1801_v29, %v3427_v20  ;;  %v1824_v33 = vrot.slane %v1811_v23, 4  ;;  %v1827_v34 = vsel %vm677_vm5, %v1811_v23, %v1826_v19 }
 0xb22   : > { %v1835_v35 = vperm.slane %v1827_v34, %v3434_v27 }
 0xb23   : > { %v1812_v38 = vrot.slane %v1807_v32, 4  ;;  %v1815_v39 = vsel %vm677_vm5, %v1807_v32, %v1814_v31  ;;  %v1825_v40 = vsel %vm677_vm5, %v1824_v33, %v1799_v0  ;;  %v1769_v33 = vsel %vm677_vm5, %v1768_v3, %v1751_v28 }
 0xb24   : > { %v1823_v42 = vperm.slane %v1815_v39, %v3434_v27  ;;  %v1831_v43 = vperm.slane %v1825_v40, %v3434_v27  ;;  %v1842_v62 = vrot.slane %v1835_v35, 4  ;;  %v1774_v41 = vmul.f32 0.35355338, %v1769_v33 }
 0xb25   : > { %v1813_v10 = vsel %vm677_vm5, %v1812_v38, %v1795_v5  ;;  %v1764_v5 = vrot.slane %v1759_v52, 4 }
 0xb26   : > { %v1819_v48 = vperm.slane %v1813_v10, %v3434_v27  ;;  %v1838_v22 = vrot.slane %v1823_v42, 4  ;;  %v1840_v24 = vrot.slane %v1831_v43, 4  ;;  %v1843_v4 = vsel %vm677_vm5, 0.0, %v1842_v62 }
 0xb27   : > { %v1855_v49 = vsel %vm677_vm5, %v1842_v62, %v1831_v43  ;;  %v1860_v51 = vrot.slane %v1843_v4, 4  ;;  %v1765_v37 = vsel %vm677_vm5, %v1764_v5, %v1747_v1  ;;  %v1767_v42 = vsel %vm677_vm5, %v1759_v52, %v1766_v30 }
 0xb28   : > { %v1836_v53 = vrot.slane %v1819_v48, 4  ;;  %v1839_v25 = vsel %vm677_vm5, 0.0, %v1838_v22  ;;  %v1841_v21 = vsel %vm677_vm5, 0.0, %v1840_v24  ;;  %v1844_v54 = vsel %vm677_vm5, %v1838_v22, %v1819_v48 }
 0xb29   : > { %v1849_v63 = vrot.slane %v1839_v25, 4  ;;  %v1859_v55 = vperm.slane %v1855_v49, %v3427_v20  ;;  %v1861_v56 = vsel %vm677_vm5, %v1860_v51, %v1841_v21  ;;  %v1848_v57 = vperm.slane %v1844_v54, %v3427_v20 }
 0xb2a   : > { %v1837_v58 = vsel %vm677_vm5, 0.0, %v1836_v53  ;;  %v1865_v59 = vperm.slane %v1861_v56, %v3427_v20  ;;  %v1772_v62 = vmul.f32 0.35355338, %v1765_v37  ;;  %v1773_v45 = vmul.f32 0.35355338, %v1767_v42 }
 0xb2b   : > { %v1880_v60 = vrot.slane %v1859_v55, 4  ;;  %v1850_v61 = vsel %vm677_vm5, %v1849_v63, %v1837_v58  ;;  %v1868_v12 = vrot.slane %v1848_v57, 4  ;;  %v1771_v10 = vsel %vm677_vm5, %v1763_v46, %v1770_v44 }
 0xb2c   : > { %v1854_v36 = vperm.slane %v1850_v61, %v3427_v20  ;;  %v1878_v0 = vrot.slane %v1865_v59, 4  ;;  %v1775_v48 = vmul.f32 0.35355338, %v1771_v10  ;;  %v3158_v46 = vpack.i.bf16 %v3747_v17, %v3743_v15 }
 0xb2d   : > { %v1881_v2 = vsel %vm677_vm5, %v1865_v59, %v1880_v60  ;;  %v3153_v25 = vpack.i.bf16 %v3749_v18, %v3733_v13 }
 0xb2e   : > { %v1869_v7 = vsel %vm677_vm5, %v1854_v36, %v1868_v12  ;;  %v1889_v8 = vperm.slane %v1881_v2, %v3434_v27  ;;  %v1866_v9 = vrot.slane %v1854_v36, 4  ;;  %v1879_v11 = vsel %vm677_vm5, %v1878_v0, %v1859_v55 }
 0xb2f   : > { %v1877_v19 = vperm.slane %v1869_v7, %v3434_v27  ;;  %v1885_v23 = vperm.slane %v1879_v11, %v3434_v27 }
 0xb30   : > { %v1894_v14 = vrot.slane %v1889_v8, 4  ;;  %v1867_v29 = vsel %vm677_vm5, %v1866_v9, %v1848_v57 }
 0xb31   : > { %v1873_v31 = vperm.slane %v1867_v29, %v3434_v27  ;;  %v1890_v32 = vrot.slane %v1885_v23, 4  ;;  %v1896_v34 = vrot.slane %v1877_v19, 4 }
 0xb32   : > { %v1895_v35 = vsel %vm677_vm5, %v1894_v14, %v1877_v19 }
 0xb33   : > { %2936 = vmatpush.xpose.msk.msra.mxu0 %vm1035_vm6, %v1895_v35  ;;  %v1891_v38 = vsel %vm677_vm5, %v1890_v32, %v1873_v31  ;;  %v1897_v39 = vsel %vm677_vm5, %v1889_v8, %v1896_v34  ;;  %v1892_v40 = vrot.slane %v1873_v31, 4 }
 0xb34   : > { %2932 = vmatpush.xpose.msk.msra.mxu1 %vm1035_vm6, %v1891_v38 }
 0xb35   : > { %v1893_v43 = vsel %vm677_vm5, %v1885_v23, %v1892_v40 }
 0xb36   : > { %2937 = vmatmul.msk.f32.vlgmr.msra.gmra.mxu0 %vm1035_vm6, %v1774_v41  ;;  %2934 = vmatpush.xpose.msk.msra.mxu2 %vm1035_vm6, %v1893_v43 }
 0xb37   : > { %2933 = vmatmul.msk.f32.vlgmr.msra.gmra.mxu1 %vm1035_vm6, %v1772_v62 }
 0xb38   : > { %2938 = vmatpush.xpose.msk.msrb.mxu1 %vm1035_vm6, %v1897_v39 }
 0xb39   : > { %2935 = vmatmul.msk.f32.vlgmr.msra.gmra.mxu2 %vm1035_vm6, %v1773_v45 }
 0xb3f   : > { %2939 = vmatmul.msk.f32.vlgmr.msrb.gmra.mxu1 %vm1035_vm6, %v1775_v48 }
 0xbb3   : > { %v2095_v22 = vpop.f32.mrf.mxu0 }
 0xbb4   : > { %v2130_v24 = vsel %vm1035_vm6, %v2095_v22, -inf  ;;  %v2043_v4 = vpop.f32.mrf.mxu1 }
 0xbb5   : > { %2131 = vmax.xlane.f32.xlu0 %v2130_v24  ;;  %v2124_v49 = vsel %vm1035_vm6, %v2043_v4, -inf }
 0xbb6   : > { %2125 = vmax.xlane.f32.xlu2 %v2124_v49 }
 0xbbc   : > { %v2069_v51 = vpop.f32.mrf.mxu2  ;;  %v2121_v6 = vpop.f32.mrf.mxu1 }
 0xbbd   : > { %v2127_v52 = vsel %vm1035_vm6, %v2069_v51, -inf  ;;  %v2133_v53 = vsel %vm1035_vm6, %v2121_v6, -inf }
 0xbbe   : > { %2128 = vmax.xlane.f32.xlu2 %v2127_v52  ;;  %2134 = vmax.xlane.f32.xlu1 %v2133_v53 }
 0xbc9   : > { %3159 = vrot.lane.b32.xlu0 %v3158_v46, %s3226_s25 }
 0xbd7   : > { %3154 = vrot.lane.b32.xlu1 %v3153_v25, %s3226_s25 }
 0xc28   : > { %v2132_v57 = vpop.xlane.xlu0 %2131 }
 0xc29   : > { %v2126_v21 = vpop.xlane.xlu2 %2125  ;;  %v2138_v17 = vsub.f32 %v2095_v22, %v2132_v57 }
 0xc2a   : > { %v2136_v54 = vsub.f32 %v2043_v4, %v2126_v21 }
 0xc2b   : > { %v2144_v13 = vmul.f32 1.442695, %v2138_v17 }
 0xc2c   : > { %v2140_v63 = vmul.f32 1.442695, %v2136_v54 }
 0xc2e   : > { %3191 = vpow2.f32 %v2140_v63 }
 0xc31   : > { %v2129_v55 = vpop.xlane.xlu2 %2128  ;;  %v2135_v56 = vpop.xlane.xlu1 %2134 }
 0xc32   : > { %v2137_v58 = vsub.f32 %v2069_v51, %v2129_v55  ;;  %v2139_v59 = vsub.f32 %v2121_v6, %v2135_v56 }
 0xc34   : > { %v3861_v60 = vpop.eup %3191  ;;  %v2142_v61 = vmul.f32 1.442695, %v2137_v58  ;;  %v2146_v15 = vmul.f32 1.442695, %v2139_v59 }
 0xc35   : > { %v2148_v12 = vsel %vm1035_vm6, %v3861_v60, 0.0 }
 0xc36   : > { %3193 = vpow2.f32 %v2142_v61  ;;  %2149 = vadd.xlane.f32.xlu2 %v2148_v12 }
 0xc37   : > { %3195 = vpow2.f32 %v2146_v15 }
 0xc38   : > { %3197 = vpow2.f32 %v2144_v13 }
 0xc3b   : > { %v3160_v2 = vpop.permute.xlu0 %3159 }
 0xc3c   : > { %v3865_v18 = vpop.eup %3193  ;;  %v3162_v3 = vunpack.i.h.bf16 %v3160_v2  ;;  %v3161_v5 = vunpack.i.l.bf16 %v3160_v2 }
 0xc3d   : > { %v3867_v36 = vpop.eup %3195  ;;  %v2151_v0 = vsel %vm1035_vm6, %v3865_v18, 0.0 }
 0xc3e   : > { %2152 = vadd.xlane.f32.xlu0 %v2151_v0  ;;  %v2157_v16 = vsel %vm1035_vm6, %v3867_v36, 0.0  ;;  %v3873_v1 = vpop.eup %3197  ;;  %v1922_v9 = vrot.slane %v3162_v3, 4  ;;  %v1910_v11 = vrot.slane %v3161_v5, 4 }
 0xc3f   : > { %2158 = vadd.xlane.f32.xlu2 %v2157_v16  ;;  %v2154_v7 = vsel %vm1035_vm6, %v3873_v1, 0.0 }
 0xc47   : > { %2155 = vadd.xlane.f32.xlu2 %v2154_v7 }
 0xc49   : > { %v3155_v8 = vpop.permute.xlu1 %3154 }
 0xc4a   : > { %v3157_v19 = vunpack.i.h.bf16 %v3155_v8  ;;  %v3156_v23 = vunpack.i.l.bf16 %v3155_v8 }
 0xc4c   : > { %v1923_v28 = vsel %vm677_vm5, %v1922_v9, %v3157_v19  ;;  %v1924_v14 = vrot.slane %v3157_v19, 4  ;;  %v1911_v29 = vsel %vm677_vm5, %v1910_v11, %v3156_v23  ;;  %v1912_v30 = vrot.slane %v3156_v23, 4 }
 0xc4d   : > { %v1929_v31 = vperm.slane %v1923_v28, %v3427_v20  ;;  %v1917_v32 = vperm.slane %v1911_v29, %v3427_v20 }
 0xc4e   : > { %v1925_v33 = vsel %vm677_vm5, %v3162_v3, %v1924_v14  ;;  %v1913_v34 = vsel %vm677_vm5, %v3161_v5, %v1912_v30 }
 0xc4f   : > { %v1933_v35 = vperm.slane %v1925_v33, %v3427_v20  ;;  %v1934_v37 = vrot.slane %v1929_v31, 4  ;;  %v1921_v38 = vperm.slane %v1913_v34, %v3427_v20  ;;  %v1936_v39 = vrot.slane %v1917_v32, 4 }
 0xc51   : > { %v1946_v40 = vrot.slane %v1933_v35, 4  ;;  %v1935_v41 = vsel %vm677_vm5, %v1934_v37, %v1917_v32  ;;  %v1937_v42 = vsel %vm677_vm5, %v1929_v31, %v1936_v39  ;;  %v1948_v43 = vrot.slane %v1921_v38, 4 }
 0xc52   : > { %v1941_v62 = vperm.slane %v1935_v41, %v3434_v27  ;;  %v1945_v44 = vperm.slane %v1937_v42, %v3434_v27 }
 0xc53   : > { %v1947_v45 = vsel %vm677_vm5, %v1946_v40, %v1921_v38  ;;  %v1949_v10 = vsel %vm677_vm5, %v1933_v35, %v1948_v43 }
 0xc54   : > { %v1953_v48 = vperm.slane %v1947_v45, %v3434_v27  ;;  %v1957_v22 = vperm.slane %v1949_v10, %v3434_v27  ;;  %v1958_v24 = vrot.slane %v1941_v62, 4  ;;  %v1960_v4 = vrot.slane %v1945_v44, 4 }
 0xc56   : > { %v1961_v49 = vsel %vm677_vm5, 0.0, %v1960_v4  ;;  %v1962_v51 = vrot.slane %v1953_v48, 4  ;;  %v1964_v6 = vrot.slane %v1957_v22, 4  ;;  %v1966_v53 = vsel %vm677_vm5, %v1960_v4, %v1941_v62 }
 0xc57   : > { %v1971_v52 = vrot.slane %v1961_v49, 4  ;;  %v1959_v46 = vsel %vm677_vm5, 0.0, %v1958_v24  ;;  %v1970_v21 = vperm.slane %v1966_v53, %v3427_v20 }
 0xc58   : > { %v1965_v25 = vsel %vm677_vm5, 0.0, %v1964_v6  ;;  %v1977_v54 = vsel %vm677_vm5, %v1964_v6, %v1953_v48  ;;  %v1963_v57 = vsel %vm677_vm5, 0.0, %v1962_v51 }
 0xc59   : > { %v1982_v63 = vrot.slane %v1965_v25, 4  ;;  %v1972_v55 = vsel %vm677_vm5, %v1971_v52, %v1959_v46  ;;  %v1981_v56 = vperm.slane %v1977_v54, %v3427_v20  ;;  %v1990_v59 = vrot.slane %v1970_v21, 4 }
 0xc5a   : > { %v1976_v58 = vperm.slane %v1972_v55, %v3427_v20 }
 0xc5b   : > { %v1983_v61 = vsel %vm677_vm5, %v1982_v63, %v1963_v57  ;;  %v2002_v15 = vrot.slane %v1981_v56, 4 }
 0xc5c   : > { %v1987_v17 = vperm.slane %v1983_v61, %v3427_v20  ;;  %v1988_v12 = vrot.slane %v1976_v58, 4  ;;  %v1991_v13 = vsel %vm677_vm5, %v1976_v58, %v1990_v59 }
 0xc5d   : > { %v1999_v2 = vperm.slane %v1991_v13, %v3434_v27 }
 0xc5e   : > { %v1989_v0 = vsel %vm677_vm5, %v1988_v12, %v1970_v21  ;;  %v2000_v16 = vrot.slane %v1987_v17, 4  ;;  %v2003_v3 = vsel %vm677_vm5, %v1987_v17, %v2002_v15 }
 0xc5f   : > { %v1995_v5 = vperm.slane %v1989_v0, %v3434_v27  ;;  %v2011_v7 = vperm.slane %v2003_v3, %v3434_v27  ;;  %v2018_v23 = vrot.slane %v1999_v2, 4 }
 0xc60   : > { %v2001_v8 = vsel %vm677_vm5, %v2000_v16, %v1981_v56 }
 0xc61   : > { %v2007_v9 = vperm.slane %v2001_v8, %v3434_v27  ;;  %v2014_v11 = vrot.slane %v1995_v5, 4  ;;  %v2016_v19 = vrot.slane %v2011_v7, 4  ;;  %v2019_v31 = vsel %vm677_vm5, %v2011_v7, %v2018_v23 }
 0xc63   : > { %v2015_v28 = vsel %vm677_vm5, %v2007_v9, %v2014_v11  ;;  %v2017_v14 = vsel %vm677_vm5, %v2016_v19, %v1999_v2  ;;  %v2012_v29 = vrot.slane %v2007_v9, 4 }
 0xc64   : > { %2209 = vmatpush.msrb.mxu0 %v2015_v28  ;;  %2232 = vmatpush.msra.mxu1 %v2017_v14 }
 0xc65   : > { %v2013_v30 = vsel %vm677_vm5, %v2012_v29, %v1995_v5 }
 0xc66   : > { %2186 = vmatpush.msrb.mxu2 %v2013_v30 }
 0xc68   : > { %2255 = vmatpush.msra.mxu2 %v2019_v31 }
 0xca9   : > { %v2150_v32 = vpop.xlane.xlu2 %2149 }
 0xcaa   : > { %3199 = vrcp.f32 %v2150_v32 }
 0xcb0   : > { %v3200_v33 = vpop.eup %3199 }
 0xcb1   : > { %v2164_v34 = vmul.f32 %v3200_v33, %v3861_v60  ;;  %v2153_v35 = vpop.xlane.xlu0 %2152 }
 0xcb2   : > { %3201 = vrcp.f32 %v2153_v35  ;;  %v2159_v37 = vpop.xlane.xlu2 %2158 }
 0xcb3   : > { %3203 = vrcp.f32 %v2159_v37  ;;  %2940 = vmatmul.msk.f32.vlgmr.msrb.gmra.mxu2 %vm1035_vm6, %v2164_v34 }
 0xcb8   : > { %v3202_v38 = vpop.eup %3201 }
 0xcb9   : > { %v3204_v39 = vpop.eup %3203  ;;  %v2165_v40 = vmul.f32 %v3202_v38, %v3865_v18 }
 0xcba   : > { %v2167_v41 = vmul.f32 %v3204_v39, %v3867_v36  ;;  %v2156_v42 = vpop.xlane.xlu2 %2155 }
 0xcbb   : > { %3205 = vrcp.f32 %v2156_v42  ;;  %2941 = vmatmul.msk.f32.vlgmr.msrb.gmra.mxu0 %vm1035_vm6, %v2165_v40 }
 0xcbc   : > { %2943 = vmatmul.msk.f32.vlgmr.msra.gmra.mxu2 %vm1035_vm6, %v2167_v41 }
 0xcc1   : > { %v3206_v43 = vpop.eup %3205 }
 0xcc2   : > { %v2166_v60 = vmul.f32 %v3206_v43, %v3873_v1 }
 0xcc4   : > { %2942 = vmatmul.msk.f32.vlgmr.msra.gmra.mxu1 %vm1035_vm6, %v2166_v60 }
 0xd36   : > { %v2188_v62 = vpop.f32.mrf.mxu2 }
 0xd37   : > { %v2262_v48 = vrot.slane %v2188_v62, 4 }
 0xd38   : > { %v2211_v44 = vpop.f32.mrf.mxu0 }
 0xd39   : > { %v2274_v45 = vrot.slane %v2211_v44, 4 }
 0xd3f   : > { %v2257_v10 = vpop.f32.mrf.mxu2 }
 0xd40   : > { %v2272_v22 = vrot.slane %v2257_v10, 4  ;;  %v2275_v18 = vsel %vm677_vm5, %v2257_v10, %v2274_v45 }
 0xd41   : > { %v2283_v36 = vperm.slane %v2275_v18, %v3427_v20  ;;  %v2234_v24 = vpop.f32.mrf.mxu1  ;;  %v3102_v18 = vld [vmem:[%s4072_s4 + $0x18] sm:$0xff] }
 0xd42   : > { %v2273_v4 = vsel %vm677_vm5, %v2272_v22, %v2211_v44  ;;  %v2260_v49 = vrot.slane %v2234_v24, 4  ;;  %v2263_v51 = vsel %vm677_vm5, %v2234_v24, %v2262_v48  ;;  %2412 = vmatpush.bf16.msra.mxu0 %v3102_v18  ;;  %v3121_v18 = vld [vmem:[%s4076_s8 + $0x40] sm:$0xff] }
 0xd43   : > { %v2279_v1 = vperm.slane %v2273_v4, %v3427_v20  ;;  %v2296_v6 = vrot.slane %v2283_v36, 4  ;;  %v2271_v52 = vperm.slane %v2263_v51, %v3427_v20 }
 0xd44   : > { %v2261_v53 = vsel %vm677_vm5, %v2260_v49, %v2188_v62 }
 0xd45   : > { %v2284_v46 = vrot.slane %v2279_v1, 4  ;;  %v2267_v25 = vperm.slane %v2261_v53, %v3427_v20  ;;  %v2297_v21 = vsel %vm677_vm5, %v2296_v6, %v2271_v52  ;;  %v2298_v54 = vrot.slane %v2271_v52, 4 }
 0xd46   : > { %v2303_v63 = vperm.slane %v2297_v21, %v3434_v27  ;;  %v2420_v52 = vperm.slane %v3727_v26, 3 }
 0xd47   : > { %v2285_v55 = vsel %vm677_vm5, %v2284_v46, %v2267_v25  ;;  %v2286_v56 = vrot.slane %v2267_v25, 4  ;;  %v2299_v57 = vsel %vm677_vm5, %v2283_v36, %v2298_v54 }
 0xd48   : > { %v2291_v58 = vperm.slane %v2285_v55, %v3434_v27  ;;  %v2307_v59 = vperm.slane %v2299_v57, %v3434_v27  ;;  %v2312_v17 = vrot.slane %v2303_v63, 4 }
 0xd49   : > { %v2287_v61 = vsel %vm677_vm5, %v2279_v1, %v2286_v56 }
 0xd4a   : > { %v2295_v15 = vperm.slane %v2287_v61, %v3434_v27  ;;  %v2314_v12 = vrot.slane %v2307_v59, 4  ;;  %v2308_v13 = vrot.slane %v2291_v58, 4  ;;  %v2313_v8 = vsel %vm677_vm5, 0.0, %v2312_v17  ;;  %v3103_v59 = vld [vmem:[%s4073_s5 + $0x10] sm:$0xff]  ;;  %v3112_v61 = vld [vmem:[%s4074_s6 + $0x78] sm:$0xff] }
 0xd4b   : > { %2558 = vmatpush.bf16.msra.mxu3 %v3112_v61 }
 0xd4c   : > { %v2310_v0 = vrot.slane %v2295_v15, 4  ;;  %v2315_v16 = vsel %vm677_vm5, 0.0, %v2314_v12  ;;  %v2327_v2 = vsel %vm677_vm5, %v2314_v12, %v2303_v63  ;;  %v2309_v14 = vsel %vm677_vm5, 0.0, %v2308_v13 }
 0xd4d   : > { %v2331_v3 = vperm.slane %v2327_v2, %v3427_v20  ;;  %v2332_v5 = vrot.slane %v2315_v16, 4 }
 0xd4e   : > { %v2311_v7 = vsel %vm677_vm5, 0.0, %v2310_v0  ;;  %v2316_v9 = vsel %vm677_vm5, %v2310_v0, %v2291_v58 }
 0xd4f   : > { %v2333_v11 = vsel %vm677_vm5, %v2332_v5, %v2313_v8  ;;  %v2320_v19 = vperm.slane %v2316_v9, %v3427_v20  ;;  %v2321_v23 = vrot.slane %v2311_v7, 4  ;;  %v2352_v28 = vrot.slane %v2331_v3, 4 }
 0xd50   : > { %v2337_v29 = vperm.slane %v2333_v11, %v3427_v20  ;;  %v2444_v7 = vperm.slane %v3727_v26, 4  ;;  %v2446_v11 = vperm.slane %v3727_v26, 5 }
 0xd51   : > { %v2322_v30 = vsel %vm677_vm5, %v2321_v23, %v2309_v14  ;;  %v2340_v31 = vrot.slane %v2320_v19, 4  ;;  %v3110_v14 = vld [vmem:[%s4074_s6 + $0x68] sm:$0xff] }
 0xd52   : > { %v2326_v32 = vperm.slane %v2322_v30, %v3427_v20  ;;  %v2353_v33 = vsel %vm677_vm5, %v2337_v29, %v2352_v28  ;;  %v2350_v34 = vrot.slane %v2337_v29, 4  ;;  %v3111_v28 = vld [vmem:[%s4074_s6 + $0x70] sm:$0xff]  ;;  %v3109_v29 = vld [vmem:[%s4074_s6 + $0x60] sm:$0xff]  ;;  %v3108_v30 = vld [vmem:[%s4074_s6 + $0x58] sm:$0xff] }
 0xd53   : > { %v2361_v35 = vperm.slane %v2353_v33, %v3434_v27  ;;  %2559 = vmatpush.bf16.msra.mxu3 %v3111_v28  ;;  %v3105_v33 = vld [vmem:[%s4074_s6 + $0x40] sm:$0xff] }
 0xd54   : > { %v2341_v37 = vsel %vm677_vm5, %v2326_v32, %v2340_v31  ;;  %v2338_v38 = vrot.slane %v2326_v32, 4  ;;  %v2351_v39 = vsel %vm677_vm5, %v2350_v34, %v2331_v3  ;;  %v3107_v31 = vld [vmem:[%s4074_s6 + $0x50] sm:$0xff]  ;;  %v3106_v32 = vld [vmem:[%s4074_s6 + $0x48] sm:$0xff]  ;;  %v2454_v34 = vperm.slane %v3727_v26, 6 }
 0xd55   : > { %v2349_v40 = vperm.slane %v2341_v37, %v3434_v27  ;;  %v2366_v41 = vrot.slane %v2361_v35, 4  ;;  %v2357_v42 = vperm.slane %v2351_v39, %v3434_v27 }
 0xd56   : > { %v2339_v43 = vsel %vm677_vm5, %v2338_v38, %v2320_v19 }
 0xd57   : > { %v2367_v60 = vsel %vm677_vm5, %v2366_v41, %v2349_v40  ;;  %v2345_v20 = vperm.slane %v2339_v43, %v3434_v27  ;;  %v2362_v62 = vrot.slane %v2357_v42, 4  ;;  %v2368_v48 = vrot.slane %v2349_v40, 4  ;;  %v3101_v27 = vld [vmem:[%s4072_s4 + $0x10] sm:$0xff]  ;;  %2560 = vmatpush.bf16.msra.mxu3 %v3110_v14 }
 0xd58   : > { %2375 = vrot.lane.b32.xlu2 %v2367_v60, %s3227_s26  ;;  %2413 = vmatpush.bf16.msra.mxu0 %v3101_v27  ;;  %v3120_v27 = vld [vmem:[%s4076_s8 + $0x38] sm:$0xff] }
 0xd59   : > { %v2364_v44 = vrot.slane %v2345_v20, 4  ;;  %v2363_v45 = vsel %vm677_vm5, %v2362_v62, %v2345_v20  ;;  %v2369_v22 = vsel %vm677_vm5, %v2361_v35, %v2368_v48  ;;  %v3113_v48 = vld [vmem:[%s4076_s8] sm:$0xff] }
 0xd5b   : > { %v2365_v10 = vsel %vm677_vm5, %v2357_v42, %v2364_v44  ;;  %2561 = vmatpush.bf16.msra.mxu3 %v3109_v29 }
 0xd5c   : > { %2371 = vrot.lane.b32.xlu1 %v2365_v10, %s3228_s27  ;;  %v3114_v10 = vld [vmem:[%s4076_s8 + $0x8] sm:$0xff] }
 0xd5d   : > { %2619 = vmatpush.bf16.msrb.mxu2 %v3114_v10 }
 0xd5f   : > { %2562 = vmatpush.bf16.msra.mxu3 %v3108_v30 }
 0xd61   : > { %2620 = vmatpush.bf16.msrb.mxu2 %v3113_v48 }
 0xd63   : > { %2563 = vmatpush.bf16.msra.mxu3 %v3107_v31 }
 0xd64   : > { %2379 = vrot.lane.b32.xlu1 %v2369_v22, %s3229_s28  ;;  %v3122_v22 = vld [vmem:[%s4076_s8 + $0x48] sm:$0xff] }
 0xd65   : > { %2677 = vmatpush.bf16.msrb.mxu0 %v3122_v22 }
 0xd67   : > { %2564 = vmatpush.bf16.msra.mxu3 %v3106_v32 }
 0xd69   : > { %2678 = vmatpush.bf16.msrb.mxu0 %v3121_v18 }
 0xd6b   : > { %2565 = vmatpush.bf16.msra.mxu3 %v3105_v33 }
 0xd6d   : > { %2679 = vmatpush.bf16.msrb.mxu0 %v3120_v27 }
 0xdb2   : > { %v2376_v4 = vpop.permute.xlu2 %2375 }
 0xdce   : > { %v2372_v36 = vpop.permute.xlu1 %2371 }
 0xdcf   : > { %v2382_v24 = vsel %vm1035_vm6, %v2363_v45, %v2372_v36  ;;  %v3119_v36 = vld [vmem:[%s4076_s8 + $0x30] sm:$0xff] }
 0xdd0   : > { %v2383_v51 = vsel %vm1399_vm7, %v2382_v24, %v2376_v4  ;;  %2680 = vmatpush.bf16.msrb.mxu0 %v3119_v36  ;;  %v3118_v24 = vld [vmem:[%s4076_s8 + $0x28] sm:$0xff]  ;;  %v3117_v4 = vld [vmem:[%s4076_s8 + $0x20] sm:$0xff] }
 0xdd4   : > { %2681 = vmatpush.bf16.msrb.mxu0 %v3118_v24 }
 0xdd6   : > { %v2380_v49 = vpop.permute.xlu1 %2379 }
 0xdd7   : > { %v2384_v1 = vsel %vm1401_vm8, %v2383_v51, %v2380_v49  ;;  %v2572_v49 = vperm.slane %v3727_v26, 7  ;;  %v3163_v26 = vld [vmem:[%s4077_s9] ss:$0 sm:$0xff] }
 0xdd8   : > { %v2385_v6 = vpack.c.bf16 %v2384_v1, %v2384_v1  ;;  %2682 = vmatpush.bf16.msrb.mxu0 %v3117_v4 }
 0xdda   : > { %2956 = vmatmul.msk.bf16.vlgmr.msra.gmra.mxu0 %vm598_vm0, %v2385_v6 }
 0xe57   : > { %v2415_v53 = vpop.f32.mrf.mxu0 }
 0xe58   : > { %v2419_v46 = vadd.f32 %v2415_v53, %v3710_v50  ;;  %v3104_v50 = vld [vmem:[%s4073_s5 + $0x18] sm:$0xff] }
 0xe59   : > { %2476 = vmatpush.bf16.msrb.mxu1 %v3104_v50 }
 0xe5a   : > { %v3980_v25 = vadd.f32 %v2420_v52, %v2419_v46  ;;  %v3116_v46 = vld [vmem:[%s4076_s8 + $0x18] sm:$0xff] }
 0xe5b   : > { %2683 = vmatpush.bf16.msrb.mxu0 %v3116_v46 }
 0xe5c   : > { %v2422_v21 = vsel %vm598_vm0, %v3980_v25, 0.0 }
 0xe5d   : > { %2423 = vadd.xlane.f32.xlu1 %v2422_v21  ;;  %2477 = vmatpush.bf16.msrb.mxu1 %v3103_v59  ;;  %v3115_v21 = vld [vmem:[%s4076_s8 + $0x10] sm:$0xff] }
 0xe5f   : > { %v2417_v54 = vpop.f32.mrf.mxu0  ;;  %2684 = vmatpush.bf16.msrb.mxu0 %v3115_v21 }
 0xed0   : > { %v2424_v63 = vpop.xlane.xlu1 %2423 }
 0xed1   : > { %v2425_v55 = vmul.f32 %v2424_v63, %v3382_v47 }
 0xed3   : > { %v2426_v56 = vsub.f32 %v3980_v25, %v2425_v55 }
 0xed5   : > { %v2427_v57 = vmul.f32 %v2426_v56, %v2426_v56 }
 0xed7   : > { %v2428_v58 = vsel %vm598_vm0, %v2427_v57, 0.0  ;;  %v3164_v57 = vld [vmem:[%s4077_s9 + $0x1] ss:$0 sm:$0xff] }
 0xed8   : > { %2429 = vadd.xlane.f32.xlu2 %v2428_v58 }
 0xf4b   : > { %v2430_v15 = vpop.xlane.xlu2 %2429 }
 0xf4c   : > { %v2431_v17 = vmul.f32 %v2430_v15, %v3382_v47 }
 0xf4e   : > { %v2432_v12 = vadd.f32 1e-12, %v2431_v17 }
 0xf50   : > { %3207 = vrsqrt.f32 %v2432_v12  ;;  %vm2439_vm1 = vweird.f32 %v2432_v12 }
 0xf56   : > { %v3208_v13 = vpop.eup %3207 }
 0xf57   : > { %v2434_v0 = vmul.f32 %v3208_v13, %v2432_v12  ;;  %vm2440_vm15 = vweird.f32 %v3208_v13 }
 0xf58   : > { %vm2441_vm2 = vmor %vm2439_vm1, %vm2440_vm15 }
 0xf59   : > { %v2435_v16 = vmul.f32 %v3208_v13, %v2434_v0 }
 0xf5b   : > { %v2436_v2 = vmul.f32 0.5, %v2435_v16 }
 0xf5d   : > { %v2437_v3 = vsub.f32 1.5, %v2436_v2 }
 0xf5f   : > { %v2438_v5 = vmul.f32 %v3208_v13, %v2437_v3 }
 0xf61   : > { %v2442_v8 = vsel %vm2441_vm2, %v3208_v13, %v2438_v5 }
 0xf62   : > { %v2443_v9 = vmul.f32 %v2442_v8, %v2426_v56 }
 0xf64   : > { %v2445_v19 = vmul.f32 %v2444_v7, %v2443_v9 }
 0xf66   : > { %v2447_v47 = vadd.f32 %v2446_v11, %v2445_v19 }
 0xf68   : > { %v2448_v23 = vpack.c.bf16 %v2447_v47, %v2447_v47 }
 0xf6a   : > { %2969 = vmatmul.msk.bf16.vlgmr.msrb.gmra.mxu1 %vm598_vm0, %v2448_v23 }
 0xfe7   : > { %v2479_v35 = vpop.f32.mrf.mxu1 }
 0xfe8   : > { %v2480_v37 = vadd.f32 %v2479_v35, %v2454_v34 }
 0xfea   : > { %v2483_v38 = vmul.f32 %v2480_v37, %v2480_v37 }
 0xfec   : > { %v2484_v39 = vmul.f32 %v2483_v38, %v2480_v37 }
 0xfee   : > { %v2485_v40 = vmul.f32 0.044715, %v2484_v39 }
 0xfef   : > { %v2481_v41 = vpop.f32.mrf.mxu1 }
 0xff0   : > { %v2486_v42 = vadd.f32 %v2485_v40, %v2480_v37 }
 0xff2   : > { %v2487_v43 = vmul.f32 0.7978846, %v2486_v42 }
 0xff4   : > { %3209 = vtanh.f32 %v2487_v43 }
 0xffa   : > { %v3210_v60 = vpop.eup %3209 }
 0xffb   : > { %v2489_v20 = vadd.f32 1.0, %v3210_v60 }
 0xffd   : > { %v2490_v62 = vmul.f32 0.5, %v2489_v20 }
 0xfff   : > { %v2491_v44 = vmul.f32 %v2490_v62, %v2480_v37 }
0x1001   : > { %v2492_v45 = vpack.c.bf16 %v2491_v44, %v2491_v44 }
0x1003   : > { %2566 = vmatmul.bf16.vlgmr.msra.gmra.mxu3 %v2492_v45 }
0x1086   : > { %v2567_v51 = vpop.f32.mrf.mxu3 }
0x1087   : > { %v2571_v1 = vadd.f32 %v2567_v51, %v3980_v25 }
0x1089   : > { %v2573_v6 = vadd.f32 %v2572_v49, %v2571_v1 }
0x108b   : > { %v2596_v52 = vpack.c.bf16 %v2573_v6, %v2573_v6 }
0x108d   : > { %3026 = vmatmul.msk.bf16.vlgmr.msrb.gmra.mxu2 %vm598_vm0, %v2596_v52 }
0x108e   : > { %v2569_v53 = vpop.f32.mrf.mxu3 }
0x1110   : > { %v2622_v25 = vpop.f32.mrf.mxu2 }
0x1111   : > { %v2623_v54 = vadd.f32 %v3163_v26, %v2622_v25 }
0x1113   : > { %v2626_v63 = vmax.f32 %v2623_v54, 0.0 }
0x1115   : > { %v2627_v55 = vpack.c.bf16 %v2626_v63, %v2626_v63 }
0x1117   : > { %2685 = vmatmul.bf16.vlgmr.msrb.gmra.mxu0 %v2627_v55 }
0x1118   : > { %v2624_v56 = vpop.f32.mrf.mxu2 }
0x1194   : > { %v2686_v58 = vpop.f32.mrf.mxu0 }
0x1195   : > { %v2687_v50 = vadd.f32 %v3164_v57, %v2686_v58 }
0x1197   : > { %2690 = vst [vmem:[%s357_s18] sm:$0xff] %v2687_v50 }
0x119c   : > { %v2688_v59 = vpop.f32.mrf.mxu0 }
0x119d PF: > { %s20_s13 = sadd.s32 1, %s3217_s13  }
0x119e   : > { %p17_p4 = scmp.ge.s32.totalorder %s20_s13, 4  }
0x11a0   :  { %19 = sbr.rel (!%p17_p4) target bundleno = 1 (0x1), region = 95 }

</bundles_post_ra>
